<compile_context>
chip_gen: v6e
topology: v6e:2x2x1
jax: 0.10.0
libtpu: 0.0.40
codegen_flags: <defaults>
</compile_context>

<pallas_src>
import math

import jax
import jax.numpy as jnp
from jax import lax
from jax.experimental import pallas as pl
from jax.experimental.pallas import tpu as pltpu

# ----------------------- model hyper-parameters -----------------------
NUM_HEADS = 2
HIDDEN = 32
KEY_SIZE = 16
VALUE_SIZE = 16
FF_SIZE = 64
DROPOUT = 0.1          # identity at inference
LN_EPS = 1e-5

DK_ALL = NUM_HEADS * KEY_SIZE
DV_ALL = NUM_HEADS * VALUE_SIZE

B = 2                  # batch
T = 8                  # target (query) sequence length
S = 8                  # source (memory) sequence length


# ----------------------- in-kernel helpers (traced inline) -----------------------
def _residual_layernorm(x, delta, gamma, beta):
    """y = LayerNorm(x + delta) * gamma + beta  (post-norm residual)."""
    y = x + delta
    mu = jnp.mean(y, axis=-1, keepdims=True)
    var = jnp.mean((y - mu) ** 2, axis=-1, keepdims=True)
    return (y - mu) * lax.rsqrt(var + LN_EPS) * gamma + beta


def _multihead_attention(q, k, v, mask01):
    """q:(M,DK_ALL) k:(N,DK_ALL) v:(N,DV_ALL) mask01:(M,N) with 1.0 == masked."""
    scale = 1.0 / math.sqrt(float(KEY_SIZE))
    neg = mask01 * jnp.float32(-1e9)
    ctx = []
    for h in range(NUM_HEADS):                       # static unroll (2 heads)
        qh = q[:, h * KEY_SIZE:(h + 1) * KEY_SIZE]
        kh = k[:, h * KEY_SIZE:(h + 1) * KEY_SIZE]
        vh = v[:, h * VALUE_SIZE:(h + 1) * VALUE_SIZE]
        # contract on dk without an explicit kh.T (no XLU transpose)
        s = lax.dot_general(qh, kh,
                            dimension_numbers=(((1,), (1,)), ((), ())),
                            preferred_element_type=jnp.float32) * scale + neg
        s = s - jnp.max(s, axis=-1, keepdims=True)
        p = jnp.exp(s)
        p = p * pl.reciprocal(jnp.sum(p, axis=-1, keepdims=True), approx=True)
        ctx.append(jnp.dot(p, vh, preferred_element_type=jnp.float32))
    return jnp.concatenate(ctx, axis=-1)             # (M, DV_ALL)


# ----------------------- the fused decoder-layer kernel -----------------------
def decoder_layer_kernel(
        xq_ref, xkv_ref, self_mask_ref, cross_mask_ref,
        # self-attention sublayer params
        wqkv_s_ref, bqkv_s_ref, wo_s_ref, bo_s_ref, g_s_ref, be_s_ref,
        # cross-attention sublayer params
        wq_c_ref, bq_c_ref, wkv_c_ref, bkv_c_ref, wo_c_ref, bo_c_ref, g_c_ref, be_c_ref,
        # feed-forward sublayer params
        w1_ref, b1_ref, w2_ref, b2_ref, g_f_ref, be_f_ref,
        out_ref):
    xq = xq_ref[...]            # (B*T, H)
    xkv = xkv_ref[...]          # (B*S, H)

    # ---------- self-attention sublayer (fused QKV projection) ----------
    qkv = jnp.dot(xq, wqkv_s_ref[...],
                  preferred_element_type=jnp.float32) + bqkv_s_ref[...]
    q = qkv[:, :DK_ALL]
    k = qkv[:, DK_ALL:2 * DK_ALL]
    v = qkv[:, 2 * DK_ALL:]
    ctx = _multihead_attention(q, k, v, self_mask_ref[...])
    attn = jnp.dot(ctx, wo_s_ref[...],
                   preferred_element_type=jnp.float32) + bo_s_ref[...]
    # TODO(synk): dropout omitted (inference / eval mode => identity)
    x = _residual_layernorm(xq, attn, g_s_ref[...], be_s_ref[...])

    # ---------- cross-attention sublayer (fused KV projection) ----------
    qc = jnp.dot(x, wq_c_ref[...],
                 preferred_element_type=jnp.float32) + bq_c_ref[...]
    kv = jnp.dot(xkv, wkv_c_ref[...],
                 preferred_element_type=jnp.float32) + bkv_c_ref[...]
    kc = kv[:, :DK_ALL]
    vc = kv[:, DK_ALL:]
    ctx_c = _multihead_attention(qc, kc, vc, cross_mask_ref[...])
    attn_c = jnp.dot(ctx_c, wo_c_ref[...],
                     preferred_element_type=jnp.float32) + bo_c_ref[...]
    x = _residual_layernorm(x, attn_c, g_c_ref[...], be_c_ref[...])

    # ---------- feed-forward sublayer ----------
    h1 = jnp.maximum(jnp.dot(x, w1_ref[...],
                             preferred_element_type=jnp.float32) + b1_ref[...], 0.0)
    f = jnp.dot(h1, w2_ref[...],
                preferred_element_type=jnp.float32) + b2_ref[...]
    x = _residual_layernorm(x, f, g_f_ref[...], be_f_ref[...])

    out_ref[...] = x.astype(out_ref.dtype)


# ----------------------- wrapper -----------------------
def decoder_layer(x_q, x_kv, causal_mask, tgt_key_padding_mask,
                  src_key_padding_mask, params):
    """Mirrors DecoderLayer.forward. Boolean masks: True == masked."""
    Bq, Tq, H = x_q.shape
    _, Sk, _ = x_kv.shape
    BT, BS = Bq * Tq, Bq * Sk

    # Block-diagonal 0/1 masks: batch is folded into the matmul M dimension, so
    # cross-batch attention entries are masked out (exactly equivalent to the
    # per-batch softmax of the reference).  1.0 == masked; -1e9 applied in-kernel.
    row_b = jnp.arange(BT, dtype=jnp.int32)[:, None] // Tq
    col_b_self = jnp.arange(BT, dtype=jnp.int32)[None, :] // Tq
    col_b_cross = jnp.arange(BS, dtype=jnp.int32)[None, :] // Sk
    self_bool = ((row_b != col_b_self)
                 | jnp.tile(causal_mask, (Bq, Bq))
                 | tgt_key_padding_mask.reshape(1, BT))
    cross_bool = (row_b != col_b_cross) | src_key_padding_mask.reshape(1, BS)
    self_mask = self_bool.astype(jnp.float32)
    cross_mask = cross_bool.astype(jnp.float32)

    sa, ca, ff = params["self_attn"], params["cross_attn"], params["ffn"]
    # Fused projection weights (one-time concat; constant-folded under jit).
    wqkv_s = jnp.concatenate([sa["wq"], sa["wk"], sa["wv"]], axis=1)   # (H, 96)
    bqkv_s = jnp.concatenate([sa["bq"], sa["bk"], sa["bv"]], axis=1)   # (1, 96)
    wkv_c = jnp.concatenate([ca["wk"], ca["wv"]], axis=1)              # (H, 64)
    bkv_c = jnp.concatenate([ca["bk"], ca["bv"]], axis=1)              # (1, 64)

    inputs = (
        x_q.reshape(BT, H), x_kv.reshape(BS, H), self_mask, cross_mask,
        wqkv_s, bqkv_s, sa["wo"], sa["bo"], sa["gamma"], sa["beta"],
        ca["wq"], ca["bq"], wkv_c, bkv_c, ca["wo"], ca["bo"], ca["gamma"], ca["beta"],
        ff["w1"], ff["b1"], ff["w2"], ff["b2"], ff["gamma"], ff["beta"],
    )

    vmem = pltpu.MemorySpace.VMEM
    out = pl.pallas_call(
        decoder_layer_kernel,
        out_shape=jax.ShapeDtypeStruct((BT, H), x_q.dtype),
        # single invocation, everything resident in VMEM (total footprint < 50 KiB)
        in_specs=[pl.BlockSpec(memory_space=vmem) for _ in inputs],
        out_specs=pl.BlockSpec(memory_space=vmem),
    )(*inputs)
    return out.reshape(Bq, Tq, H)


decoder_layer_jit = jax.jit(decoder_layer)


# ----------------------- deterministic parameter init -----------------------
def init_attn_params(key):
    ks = jax.random.split(key, 4)
    wq = jax.random.normal(ks[0], (HIDDEN, DK_ALL), jnp.float32) * 0.05
    wk = jax.random.normal(ks[1], (HIDDEN, DK_ALL), jnp.float32) * 0.05
    wv = jax.random.normal(ks[2], (HIDDEN, DV_ALL), jnp.float32) * 0.05
    wo = jax.random.normal(ks[3], (DV_ALL, HIDDEN), jnp.float32) * 0.05
    return dict(
        wq=wq, bq=jnp.zeros((1, DK_ALL), jnp.float32),
        wk=wk, bk=jnp.zeros((1, DK_ALL), jnp.float32),
        wv=wv, bv=jnp.zeros((1, DV_ALL), jnp.float32),
        wo=wo, bo=jnp.zeros((1, HIDDEN), jnp.float32),
        gamma=jnp.ones((1, HIDDEN), jnp.float32),
        beta=jnp.zeros((1, HIDDEN), jnp.float32),
    )


def init_ffn_params(key):
    ks = jax.random.split(key, 2)
    w1 = jax.random.normal(ks[0], (HIDDEN, FF_SIZE), jnp.float32) * 0.05
    w2 = jax.random.normal(ks[1], (FF_SIZE, HIDDEN), jnp.float32) * 0.05
    return dict(
        w1=w1, b1=jnp.zeros((1, FF_SIZE), jnp.float32),
        w2=w2, b2=jnp.zeros((1, HIDDEN), jnp.float32),
        gamma=jnp.ones((1, HIDDEN), jnp.float32),
        beta=jnp.zeros((1, HIDDEN), jnp.float32),
    )


# ----------------------- pure-JAX reference (sanity check) -----------------------
def ref_attn_sublayer(xq, xkv, add_mask, p):
    q = xq @ p["wq"] + p["bq"]
    k = xkv @ p["wk"] + p["bk"]
    v = xkv @ p["wv"] + p["bv"]
    ctx = []
    for h in range(NUM_HEADS):
        qh = q[..., h * KEY_SIZE:(h + 1) * KEY_SIZE]
        kh = k[..., h * KEY_SIZE:(h + 1) * KEY_SIZE]
        vh = v[..., h * VALUE_SIZE:(h + 1) * VALUE_SIZE]
        sc = jnp.einsum("btd,bsd->bts", qh, kh) / math.sqrt(KEY_SIZE) + add_mask
        pr = jax.nn.softmax(sc, axis=-1)
        ctx.append(jnp.einsum("bts,bsd->btd", pr, vh))
    ctx = jnp.concatenate(ctx, axis=-1)
    y = xq + (ctx @ p["wo"] + p["bo"])
    mu = y.mean(-1, keepdims=True)
    var = ((y - mu) ** 2).mean(-1, keepdims=True)
    return ((y - mu) * lax.rsqrt(var + LN_EPS)) * p["gamma"] + p["beta"]


def ref_ffn_sublayer(x, p):
    y = x + (jnp.maximum(x @ p["w1"] + p["b1"], 0.0) @ p["w2"] + p["b2"])
    mu = y.mean(-1, keepdims=True)
    var = ((y - mu) ** 2).mean(-1, keepdims=True)
    return ((y - mu) * lax.rsqrt(var + LN_EPS)) * p["gamma"] + p["beta"]


def ref_decoder_layer(x_q, x_kv, causal_mask, tgt_pad, src_pad, params):
    neg = jnp.float32(-1e9)
    self_add = jnp.where(causal_mask[None] | tgt_pad[:, None, :], neg, 0.0)
    cross_add = jnp.where(jnp.broadcast_to(src_pad[:, None, :], (B, T, S)), neg, 0.0)
    x = ref_attn_sublayer(x_q, x_q, self_add, params["self_attn"])
    x = ref_attn_sublayer(x, x_kv, cross_add, params["cross_attn"])
    return ref_ffn_sublayer(x, params["ffn"])


# ----------------------- main -----------------------
if __name__ == "__main__":
    root = jax.random.PRNGKey(0)
    k_xq, k_xkv, k_p1, k_p2, k_p3 = jax.random.split(root, 5)

    x_q = jax.random.normal(k_xq, (B, T, HIDDEN), jnp.float32)
    x_kv = jax.random.normal(k_xkv, (B, S, HIDDEN), jnp.float32)

    # causal mask: True above the diagonal (future positions masked)
    causal_mask = jnp.triu(jnp.ones((T, T), jnp.bool_), k=1)
    # key padding masks: True == padded position
    tgt_key_padding_mask = jnp.zeros((B, T), jnp.bool_).at[1, T - 1].set(True)
    src_key_padding_mask = jnp.zeros((B, S), jnp.bool_).at[0, S - 1].set(True)

    params = {
        "self_attn": init_attn_params(k_p1),
        "cross_attn": init_attn_params(k_p2),
        "ffn": init_ffn_params(k_p3),
    }

    out = decoder_layer_jit(x_q, x_kv, causal_mask, tgt_key_padding_mask,
                            src_key_padding_mask, params)
    out = jax.block_until_ready(out)

    ref = ref_decoder_layer(x_q, x_kv, causal_mask, tgt_key_padding_mask,
                            src_key_padding_mask, params)
    assert out.shape == (B, T, HIDDEN)
    assert jnp.max(jnp.abs(out - ref)) < 2e-3

    print("KERNEL_OK")
</pallas_src>

<mosaic_0001>
module attributes {stable_mosaic.version = 11 : i64} {
  func.func @decoder_layer_kernel(%arg0: memref<16x32xf32, #tpu.memory_space<vmem>>, %arg1: memref<16x32xf32, #tpu.memory_space<vmem>>, %arg2: memref<16x16xf32, #tpu.memory_space<vmem>>, %arg3: memref<16x16xf32, #tpu.memory_space<vmem>>, %arg4: memref<32x96xf32, #tpu.memory_space<vmem>>, %arg5: memref<1x96xf32, #tpu.memory_space<vmem>>, %arg6: memref<32x32xf32, #tpu.memory_space<vmem>>, %arg7: memref<1x32xf32, #tpu.memory_space<vmem>>, %arg8: memref<1x32xf32, #tpu.memory_space<vmem>>, %arg9: memref<1x32xf32, #tpu.memory_space<vmem>>, %arg10: memref<32x32xf32, #tpu.memory_space<vmem>>, %arg11: memref<1x32xf32, #tpu.memory_space<vmem>>, %arg12: memref<32x64xf32, #tpu.memory_space<vmem>>, %arg13: memref<1x64xf32, #tpu.memory_space<vmem>>, %arg14: memref<32x32xf32, #tpu.memory_space<vmem>>, %arg15: memref<1x32xf32, #tpu.memory_space<vmem>>, %arg16: memref<1x32xf32, #tpu.memory_space<vmem>>, %arg17: memref<1x32xf32, #tpu.memory_space<vmem>>, %arg18: memref<32x64xf32, #tpu.memory_space<vmem>>, %arg19: memref<1x64xf32, #tpu.memory_space<vmem>>, %arg20: memref<64x32xf32, #tpu.memory_space<vmem>>, %arg21: memref<1x32xf32, #tpu.memory_space<vmem>>, %arg22: memref<1x32xf32, #tpu.memory_space<vmem>>, %arg23: memref<1x32xf32, #tpu.memory_space<vmem>>, %arg24: memref<16x32xf32, #tpu.memory_space<vmem>>) attributes {dimension_semantics = [], scalar_prefetch = 0 : i64, scratch_operands = 0 : i64, tpu.core_type = #tpu.core_type<tc>} {
    %c0 = arith.constant 0 : index
    %c0_0 = arith.constant 0 : index
    %0 = vector.load %arg0[%c0, %c0_0] : memref<16x32xf32, #tpu.memory_space<vmem>>, vector<16x32xf32>
    %c0_1 = arith.constant 0 : index
    %c0_2 = arith.constant 0 : index
    %1 = vector.load %arg1[%c0_1, %c0_2] : memref<16x32xf32, #tpu.memory_space<vmem>>, vector<16x32xf32>
    %c0_3 = arith.constant 0 : index
    %c0_4 = arith.constant 0 : index
    %2 = vector.load %arg4[%c0_3, %c0_4] : memref<32x96xf32, #tpu.memory_space<vmem>>, vector<32x96xf32>
    %cst = arith.constant dense<0.000000e+00> : vector<16x96xf32>
    %3 = tpu.matmul %0, %2, %cst {dimension_numbers = #tpu.dot_dimension_numbers<[1], [0], [0], [1], [0, 0, 1, 1], [], []>} : vector<16x32xf32>, vector<32x96xf32>, vector<16x96xf32> -> vector<16x96xf32>
    %c0_5 = arith.constant 0 : index
    %c0_6 = arith.constant 0 : index
    %4 = vector.load %arg5[%c0_5, %c0_6] : memref<1x96xf32, #tpu.memory_space<vmem>>, vector<1x96xf32>
    %5 = vector.broadcast %4 : vector<1x96xf32> to vector<16x96xf32>
    %6 = arith.addf %3, %5 : vector<16x96xf32>
    %7 = vector.extract_strided_slice %6 {offsets = [0, 0], sizes = [16, 32], strides = [1, 1]} : vector<16x96xf32> to vector<16x32xf32>
    %8 = vector.extract_strided_slice %6 {offsets = [0, 32], sizes = [16, 32], strides = [1, 1]} : vector<16x96xf32> to vector<16x32xf32>
    %9 = vector.extract_strided_slice %6 {offsets = [0, 64], sizes = [16, 32], strides = [1, 1]} : vector<16x96xf32> to vector<16x32xf32>
    %c0_7 = arith.constant 0 : index
    %c0_8 = arith.constant 0 : index
    %10 = vector.load %arg2[%c0_7, %c0_8] : memref<16x16xf32, #tpu.memory_space<vmem>>, vector<16x16xf32>
    %cst_9 = arith.constant -1.000000e+09 : f32
    %11 = vector.broadcast %cst_9 : f32 to vector<16x16xf32>
    %12 = arith.mulf %10, %11 : vector<16x16xf32>
    %13 = vector.extract_strided_slice %7 {offsets = [0, 0], sizes = [16, 16], strides = [1, 1]} : vector<16x32xf32> to vector<16x16xf32>
    %14 = vector.extract_strided_slice %8 {offsets = [0, 0], sizes = [16, 16], strides = [1, 1]} : vector<16x32xf32> to vector<16x16xf32>
    %15 = vector.extract_strided_slice %9 {offsets = [0, 0], sizes = [16, 16], strides = [1, 1]} : vector<16x32xf32> to vector<16x16xf32>
    %cst_10 = arith.constant dense<0.000000e+00> : vector<16x16xf32>
    %16 = tpu.matmul %13, %14, %cst_10 {dimension_numbers = #tpu.dot_dimension_numbers<[1], [1], [0], [0], [0, 0, 1, 0], [], []>} : vector<16x16xf32>, vector<16x16xf32>, vector<16x16xf32> -> vector<16x16xf32>
    %cst_11 = arith.constant 2.500000e-01 : f32
    %17 = vector.broadcast %cst_11 : f32 to vector<16x16xf32>
    %18 = arith.mulf %16, %17 : vector<16x16xf32>
    %19 = arith.addf %18, %12 : vector<16x16xf32>
    %cst_12 = arith.constant dense<0xFF800000> : vector<16xf32>
    %20 = vector.multi_reduction <maximumf>, %19, %cst_12 [1] : vector<16x16xf32> to vector<16xf32>
    %21 = vector.shape_cast %20 : vector<16xf32> to vector<16x1xf32>
    %22 = vector.broadcast %21 : vector<16x1xf32> to vector<16x16xf32>
    %23 = arith.subf %19, %22 : vector<16x16xf32>
    %24 = math.exp %23 : vector<16x16xf32>
    %cst_13 = arith.constant dense<0.000000e+00> : vector<16xf32>
    %25 = vector.multi_reduction <add>, %24, %cst_13 [1] : vector<16x16xf32> to vector<16xf32>
    %26 = vector.shape_cast %25 : vector<16xf32> to vector<16x1xf32>
    %27 = tpu.reciprocal %26 {approx = true} : vector<16x1xf32> -> vector<16x1xf32>
    %28 = vector.broadcast %27 : vector<16x1xf32> to vector<16x16xf32>
    %29 = arith.mulf %24, %28 : vector<16x16xf32>
    %cst_14 = arith.constant dense<0.000000e+00> : vector<16x16xf32>
    %30 = tpu.matmul %29, %15, %cst_14 {dimension_numbers = #tpu.dot_dimension_numbers<[1], [0], [0], [1], [0, 0, 1, 1], [], []>} : vector<16x16xf32>, vector<16x16xf32>, vector<16x16xf32> -> vector<16x16xf32>
    %31 = vector.extract_strided_slice %7 {offsets = [0, 16], sizes = [16, 16], strides = [1, 1]} : vector<16x32xf32> to vector<16x16xf32>
    %32 = vector.extract_strided_slice %8 {offsets = [0, 16], sizes = [16, 16], strides = [1, 1]} : vector<16x32xf32> to vector<16x16xf32>
    %33 = vector.extract_strided_slice %9 {offsets = [0, 16], sizes = [16, 16], strides = [1, 1]} : vector<16x32xf32> to vector<16x16xf32>
    %cst_15 = arith.constant dense<0.000000e+00> : vector<16x16xf32>
    %34 = tpu.matmul %31, %32, %cst_15 {dimension_numbers = #tpu.dot_dimension_numbers<[1], [1], [0], [0], [0, 0, 1, 0], [], []>} : vector<16x16xf32>, vector<16x16xf32>, vector<16x16xf32> -> vector<16x16xf32>
    %cst_16 = arith.constant 2.500000e-01 : f32
    %35 = vector.broadcast %cst_16 : f32 to vector<16x16xf32>
    %36 = arith.mulf %34, %35 : vector<16x16xf32>
    %37 = arith.addf %36, %12 : vector<16x16xf32>
    %cst_17 = arith.constant dense<0xFF800000> : vector<16xf32>
    %38 = vector.multi_reduction <maximumf>, %37, %cst_17 [1] : vector<16x16xf32> to vector<16xf32>
    %39 = vector.shape_cast %38 : vector<16xf32> to vector<16x1xf32>
    %40 = vector.broadcast %39 : vector<16x1xf32> to vector<16x16xf32>
    %41 = arith.subf %37, %40 : vector<16x16xf32>
    %42 = math.exp %41 : vector<16x16xf32>
    %cst_18 = arith.constant dense<0.000000e+00> : vector<16xf32>
    %43 = vector.multi_reduction <add>, %42, %cst_18 [1] : vector<16x16xf32> to vector<16xf32>
    %44 = vector.shape_cast %43 : vector<16xf32> to vector<16x1xf32>
    %45 = tpu.reciprocal %44 {approx = true} : vector<16x1xf32> -> vector<16x1xf32>
    %46 = vector.broadcast %45 : vector<16x1xf32> to vector<16x16xf32>
    %47 = arith.mulf %42, %46 : vector<16x16xf32>
    %cst_19 = arith.constant dense<0.000000e+00> : vector<16x16xf32>
    %48 = tpu.matmul %47, %33, %cst_19 {dimension_numbers = #tpu.dot_dimension_numbers<[1], [0], [0], [1], [0, 0, 1, 1], [], []>} : vector<16x16xf32>, vector<16x16xf32>, vector<16x16xf32> -> vector<16x16xf32>
    %49 = tpu.concatenate %30, %48 in 1 : vector<16x16xf32>, vector<16x16xf32> -> vector<16x32xf32>
    %c0_20 = arith.constant 0 : index
    %c0_21 = arith.constant 0 : index
    %50 = vector.load %arg6[%c0_20, %c0_21] : memref<32x32xf32, #tpu.memory_space<vmem>>, vector<32x32xf32>
    %cst_22 = arith.constant dense<0.000000e+00> : vector<16x32xf32>
    %51 = tpu.matmul %49, %50, %cst_22 {dimension_numbers = #tpu.dot_dimension_numbers<[1], [0], [0], [1], [0, 0, 1, 1], [], []>} : vector<16x32xf32>, vector<32x32xf32>, vector<16x32xf32> -> vector<16x32xf32>
    %c0_23 = arith.constant 0 : index
    %c0_24 = arith.constant 0 : index
    %52 = vector.load %arg7[%c0_23, %c0_24] : memref<1x32xf32, #tpu.memory_space<vmem>>, vector<1x32xf32>
    %53 = vector.broadcast %52 : vector<1x32xf32> to vector<16x32xf32>
    %54 = arith.addf %51, %53 : vector<16x32xf32>
    %c0_25 = arith.constant 0 : index
    %c0_26 = arith.constant 0 : index
    %55 = vector.load %arg8[%c0_25, %c0_26] : memref<1x32xf32, #tpu.memory_space<vmem>>, vector<1x32xf32>
    %c0_27 = arith.constant 0 : index
    %c0_28 = arith.constant 0 : index
    %56 = vector.load %arg9[%c0_27, %c0_28] : memref<1x32xf32, #tpu.memory_space<vmem>>, vector<1x32xf32>
    %57 = arith.addf %0, %54 : vector<16x32xf32>
    %cst_29 = arith.constant dense<0.000000e+00> : vector<16xf32>
    %58 = vector.multi_reduction <add>, %57, %cst_29 [1] : vector<16x32xf32> to vector<16xf32>
    %59 = vector.shape_cast %58 : vector<16xf32> to vector<16x1xf32>
    %cst_30 = arith.constant 3.200000e+01 : f32
    %60 = vector.broadcast %cst_30 : f32 to vector<16x1xf32>
    %61 = arith.divf %59, %60 : vector<16x1xf32>
    %62 = vector.broadcast %61 : vector<16x1xf32> to vector<16x32xf32>
    %63 = arith.subf %57, %62 : vector<16x32xf32>
    %64 = arith.mulf %63, %63 : vector<16x32xf32>
    %cst_31 = arith.constant dense<0.000000e+00> : vector<16xf32>
    %65 = vector.multi_reduction <add>, %64, %cst_31 [1] : vector<16x32xf32> to vector<16xf32>
    %66 = vector.shape_cast %65 : vector<16xf32> to vector<16x1xf32>
    %cst_32 = arith.constant 3.200000e+01 : f32
    %67 = vector.broadcast %cst_32 : f32 to vector<16x1xf32>
    %68 = arith.divf %66, %67 : vector<16x1xf32>
    %69 = vector.broadcast %61 : vector<16x1xf32> to vector<16x32xf32>
    %70 = arith.subf %57, %69 : vector<16x32xf32>
    %cst_33 = arith.constant 9.99999974E-6 : f32
    %71 = vector.broadcast %cst_33 : f32 to vector<16x1xf32>
    %72 = arith.addf %68, %71 : vector<16x1xf32>
    %73 = math.rsqrt %72 : vector<16x1xf32>
    %74 = vector.broadcast %73 : vector<16x1xf32> to vector<16x32xf32>
    %75 = arith.mulf %70, %74 : vector<16x32xf32>
    %76 = vector.broadcast %55 : vector<1x32xf32> to vector<16x32xf32>
    %77 = arith.mulf %75, %76 : vector<16x32xf32>
    %78 = vector.broadcast %56 : vector<1x32xf32> to vector<16x32xf32>
    %79 = arith.addf %77, %78 : vector<16x32xf32>
    %c0_34 = arith.constant 0 : index
    %c0_35 = arith.constant 0 : index
    %80 = vector.load %arg10[%c0_34, %c0_35] : memref<32x32xf32, #tpu.memory_space<vmem>>, vector<32x32xf32>
    %cst_36 = arith.constant dense<0.000000e+00> : vector<16x32xf32>
    %81 = tpu.matmul %79, %80, %cst_36 {dimension_numbers = #tpu.dot_dimension_numbers<[1], [0], [0], [1], [0, 0, 1, 1], [], []>} : vector<16x32xf32>, vector<32x32xf32>, vector<16x32xf32> -> vector<16x32xf32>
    %c0_37 = arith.constant 0 : index
    %c0_38 = arith.constant 0 : index
    %82 = vector.load %arg11[%c0_37, %c0_38] : memref<1x32xf32, #tpu.memory_space<vmem>>, vector<1x32xf32>
    %83 = vector.broadcast %82 : vector<1x32xf32> to vector<16x32xf32>
    %84 = arith.addf %81, %83 : vector<16x32xf32>
    %c0_39 = arith.constant 0 : index
    %c0_40 = arith.constant 0 : index
    %85 = vector.load %arg12[%c0_39, %c0_40] : memref<32x64xf32, #tpu.memory_space<vmem>>, vector<32x64xf32>
    %cst_41 = arith.constant dense<0.000000e+00> : vector<16x64xf32>
    %86 = tpu.matmul %1, %85, %cst_41 {dimension_numbers = #tpu.dot_dimension_numbers<[1], [0], [0], [1], [0, 0, 1, 1], [], []>} : vector<16x32xf32>, vector<32x64xf32>, vector<16x64xf32> -> vector<16x64xf32>
    %c0_42 = arith.constant 0 : index
    %c0_43 = arith.constant 0 : index
    %87 = vector.load %arg13[%c0_42, %c0_43] : memref<1x64xf32, #tpu.memory_space<vmem>>, vector<1x64xf32>
    %88 = vector.broadcast %87 : vector<1x64xf32> to vector<16x64xf32>
    %89 = arith.addf %86, %88 : vector<16x64xf32>
    %90 = vector.extract_strided_slice %89 {offsets = [0, 0], sizes = [16, 32], strides = [1, 1]} : vector<16x64xf32> to vector<16x32xf32>
    %91 = vector.extract_strided_slice %89 {offsets = [0, 32], sizes = [16, 32], strides = [1, 1]} : vector<16x64xf32> to vector<16x32xf32>
    %c0_44 = arith.constant 0 : index
    %c0_45 = arith.constant 0 : index
    %92 = vector.load %arg3[%c0_44, %c0_45] : memref<16x16xf32, #tpu.memory_space<vmem>>, vector<16x16xf32>
    %cst_46 = arith.constant -1.000000e+09 : f32
    %93 = vector.broadcast %cst_46 : f32 to vector<16x16xf32>
    %94 = arith.mulf %92, %93 : vector<16x16xf32>
    %95 = vector.extract_strided_slice %84 {offsets = [0, 0], sizes = [16, 16], strides = [1, 1]} : vector<16x32xf32> to vector<16x16xf32>
    %96 = vector.extract_strided_slice %90 {offsets = [0, 0], sizes = [16, 16], strides = [1, 1]} : vector<16x32xf32> to vector<16x16xf32>
    %97 = vector.extract_strided_slice %91 {offsets = [0, 0], sizes = [16, 16], strides = [1, 1]} : vector<16x32xf32> to vector<16x16xf32>
    %cst_47 = arith.constant dense<0.000000e+00> : vector<16x16xf32>
    %98 = tpu.matmul %95, %96, %cst_47 {dimension_numbers = #tpu.dot_dimension_numbers<[1], [1], [0], [0], [0, 0, 1, 0], [], []>} : vector<16x16xf32>, vector<16x16xf32>, vector<16x16xf32> -> vector<16x16xf32>
    %cst_48 = arith.constant 2.500000e-01 : f32
    %99 = vector.broadcast %cst_48 : f32 to vector<16x16xf32>
    %100 = arith.mulf %98, %99 : vector<16x16xf32>
    %101 = arith.addf %100, %94 : vector<16x16xf32>
    %cst_49 = arith.constant dense<0xFF800000> : vector<16xf32>
    %102 = vector.multi_reduction <maximumf>, %101, %cst_49 [1] : vector<16x16xf32> to vector<16xf32>
    %103 = vector.shape_cast %102 : vector<16xf32> to vector<16x1xf32>
    %104 = vector.broadcast %103 : vector<16x1xf32> to vector<16x16xf32>
    %105 = arith.subf %101, %104 : vector<16x16xf32>
    %106 = math.exp %105 : vector<16x16xf32>
    %cst_50 = arith.constant dense<0.000000e+00> : vector<16xf32>
    %107 = vector.multi_reduction <add>, %106, %cst_50 [1] : vector<16x16xf32> to vector<16xf32>
    %108 = vector.shape_cast %107 : vector<16xf32> to vector<16x1xf32>
    %109 = tpu.reciprocal %108 {approx = true} : vector<16x1xf32> -> vector<16x1xf32>
    %110 = vector.broadcast %109 : vector<16x1xf32> to vector<16x16xf32>
    %111 = arith.mulf %106, %110 : vector<16x16xf32>
    %cst_51 = arith.constant dense<0.000000e+00> : vector<16x16xf32>
    %112 = tpu.matmul %111, %97, %cst_51 {dimension_numbers = #tpu.dot_dimension_numbers<[1], [0], [0], [1], [0, 0, 1, 1], [], []>} : vector<16x16xf32>, vector<16x16xf32>, vector<16x16xf32> -> vector<16x16xf32>
    %113 = vector.extract_strided_slice %84 {offsets = [0, 16], sizes = [16, 16], strides = [1, 1]} : vector<16x32xf32> to vector<16x16xf32>
    %114 = vector.extract_strided_slice %90 {offsets = [0, 16], sizes = [16, 16], strides = [1, 1]} : vector<16x32xf32> to vector<16x16xf32>
    %115 = vector.extract_strided_slice %91 {offsets = [0, 16], sizes = [16, 16], strides = [1, 1]} : vector<16x32xf32> to vector<16x16xf32>
    %cst_52 = arith.constant dense<0.000000e+00> : vector<16x16xf32>
    %116 = tpu.matmul %113, %114, %cst_52 {dimension_numbers = #tpu.dot_dimension_numbers<[1], [1], [0], [0], [0, 0, 1, 0], [], []>} : vector<16x16xf32>, vector<16x16xf32>, vector<16x16xf32> -> vector<16x16xf32>
    %cst_53 = arith.constant 2.500000e-01 : f32
    %117 = vector.broadcast %cst_53 : f32 to vector<16x16xf32>
    %118 = arith.mulf %116, %117 : vector<16x16xf32>
    %119 = arith.addf %118, %94 : vector<16x16xf32>
    %cst_54 = arith.constant dense<0xFF800000> : vector<16xf32>
    %120 = vector.multi_reduction <maximumf>, %119, %cst_54 [1] : vector<16x16xf32> to vector<16xf32>
    %121 = vector.shape_cast %120 : vector<16xf32> to vector<16x1xf32>
    %122 = vector.broadcast %121 : vector<16x1xf32> to vector<16x16xf32>
    %123 = arith.subf %119, %122 : vector<16x16xf32>
    %124 = math.exp %123 : vector<16x16xf32>
    %cst_55 = arith.constant dense<0.000000e+00> : vector<16xf32>
    %125 = vector.multi_reduction <add>, %124, %cst_55 [1] : vector<16x16xf32> to vector<16xf32>
    %126 = vector.shape_cast %125 : vector<16xf32> to vector<16x1xf32>
    %127 = tpu.reciprocal %126 {approx = true} : vector<16x1xf32> -> vector<16x1xf32>
    %128 = vector.broadcast %127 : vector<16x1xf32> to vector<16x16xf32>
    %129 = arith.mulf %124, %128 : vector<16x16xf32>
    %cst_56 = arith.constant dense<0.000000e+00> : vector<16x16xf32>
    %130 = tpu.matmul %129, %115, %cst_56 {dimension_numbers = #tpu.dot_dimension_numbers<[1], [0], [0], [1], [0, 0, 1, 1], [], []>} : vector<16x16xf32>, vector<16x16xf32>, vector<16x16xf32> -> vector<16x16xf32>
    %131 = tpu.concatenate %112, %130 in 1 : vector<16x16xf32>, vector<16x16xf32> -> vector<16x32xf32>
    %c0_57 = arith.constant 0 : index
    %c0_58 = arith.constant 0 : index
    %132 = vector.load %arg14[%c0_57, %c0_58] : memref<32x32xf32, #tpu.memory_space<vmem>>, vector<32x32xf32>
    %cst_59 = arith.constant dense<0.000000e+00> : vector<16x32xf32>
    %133 = tpu.matmul %131, %132, %cst_59 {dimension_numbers = #tpu.dot_dimension_numbers<[1], [0], [0], [1], [0, 0, 1, 1], [], []>} : vector<16x32xf32>, vector<32x32xf32>, vector<16x32xf32> -> vector<16x32xf32>
    %c0_60 = arith.constant 0 : index
    %c0_61 = arith.constant 0 : index
    %134 = vector.load %arg15[%c0_60, %c0_61] : memref<1x32xf32, #tpu.memory_space<vmem>>, vector<1x32xf32>
    %135 = vector.broadcast %134 : vector<1x32xf32> to vector<16x32xf32>
    %136 = arith.addf %133, %135 : vector<16x32xf32>
    %c0_62 = arith.constant 0 : index
    %c0_63 = arith.constant 0 : index
    %137 = vector.load %arg16[%c0_62, %c0_63] : memref<1x32xf32, #tpu.memory_space<vmem>>, vector<1x32xf32>
    %c0_64 = arith.constant 0 : index
    %c0_65 = arith.constant 0 : index
    %138 = vector.load %arg17[%c0_64, %c0_65] : memref<1x32xf32, #tpu.memory_space<vmem>>, vector<1x32xf32>
    %139 = arith.addf %79, %136 : vector<16x32xf32>
    %cst_66 = arith.constant dense<0.000000e+00> : vector<16xf32>
    %140 = vector.multi_reduction <add>, %139, %cst_66 [1] : vector<16x32xf32> to vector<16xf32>
    %141 = vector.shape_cast %140 : vector<16xf32> to vector<16x1xf32>
    %cst_67 = arith.constant 3.200000e+01 : f32
    %142 = vector.broadcast %cst_67 : f32 to vector<16x1xf32>
    %143 = arith.divf %141, %142 : vector<16x1xf32>
    %144 = vector.broadcast %143 : vector<16x1xf32> to vector<16x32xf32>
    %145 = arith.subf %139, %144 : vector<16x32xf32>
    %146 = arith.mulf %145, %145 : vector<16x32xf32>
    %cst_68 = arith.constant dense<0.000000e+00> : vector<16xf32>
    %147 = vector.multi_reduction <add>, %146, %cst_68 [1] : vector<16x32xf32> to vector<16xf32>
    %148 = vector.shape_cast %147 : vector<16xf32> to vector<16x1xf32>
    %cst_69 = arith.constant 3.200000e+01 : f32
    %149 = vector.broadcast %cst_69 : f32 to vector<16x1xf32>
    %150 = arith.divf %148, %149 : vector<16x1xf32>
    %151 = vector.broadcast %143 : vector<16x1xf32> to vector<16x32xf32>
    %152 = arith.subf %139, %151 : vector<16x32xf32>
    %cst_70 = arith.constant 9.99999974E-6 : f32
    %153 = vector.broadcast %cst_70 : f32 to vector<16x1xf32>
    %154 = arith.addf %150, %153 : vector<16x1xf32>
    %155 = math.rsqrt %154 : vector<16x1xf32>
    %156 = vector.broadcast %155 : vector<16x1xf32> to vector<16x32xf32>
    %157 = arith.mulf %152, %156 : vector<16x32xf32>
    %158 = vector.broadcast %137 : vector<1x32xf32> to vector<16x32xf32>
    %159 = arith.mulf %157, %158 : vector<16x32xf32>
    %160 = vector.broadcast %138 : vector<1x32xf32> to vector<16x32xf32>
    %161 = arith.addf %159, %160 : vector<16x32xf32>
    %c0_71 = arith.constant 0 : index
    %c0_72 = arith.constant 0 : index
    %162 = vector.load %arg18[%c0_71, %c0_72] : memref<32x64xf32, #tpu.memory_space<vmem>>, vector<32x64xf32>
    %cst_73 = arith.constant dense<0.000000e+00> : vector<16x64xf32>
    %163 = tpu.matmul %161, %162, %cst_73 {dimension_numbers = #tpu.dot_dimension_numbers<[1], [0], [0], [1], [0, 0, 1, 1], [], []>} : vector<16x32xf32>, vector<32x64xf32>, vector<16x64xf32> -> vector<16x64xf32>
    %c0_74 = arith.constant 0 : index
    %c0_75 = arith.constant 0 : index
    %164 = vector.load %arg19[%c0_74, %c0_75] : memref<1x64xf32, #tpu.memory_space<vmem>>, vector<1x64xf32>
    %165 = vector.broadcast %164 : vector<1x64xf32> to vector<16x64xf32>
    %166 = arith.addf %163, %165 : vector<16x64xf32>
    %cst_76 = arith.constant 0.000000e+00 : f32
    %167 = vector.broadcast %cst_76 : f32 to vector<16x64xf32>
    %168 = arith.maximumf %166, %167 : vector<16x64xf32>
    %c0_77 = arith.constant 0 : index
    %c0_78 = arith.constant 0 : index
    %169 = vector.load %arg20[%c0_77, %c0_78] : memref<64x32xf32, #tpu.memory_space<vmem>>, vector<64x32xf32>
    %cst_79 = arith.constant dense<0.000000e+00> : vector<16x32xf32>
    %170 = tpu.matmul %168, %169, %cst_79 {dimension_numbers = #tpu.dot_dimension_numbers<[1], [0], [0], [1], [0, 0, 1, 1], [], []>} : vector<16x64xf32>, vector<64x32xf32>, vector<16x32xf32> -> vector<16x32xf32>
    %c0_80 = arith.constant 0 : index
    %c0_81 = arith.constant 0 : index
    %171 = vector.load %arg21[%c0_80, %c0_81] : memref<1x32xf32, #tpu.memory_space<vmem>>, vector<1x32xf32>
    %172 = vector.broadcast %171 : vector<1x32xf32> to vector<16x32xf32>
    %173 = arith.addf %170, %172 : vector<16x32xf32>
    %c0_82 = arith.constant 0 : index
    %c0_83 = arith.constant 0 : index
    %174 = vector.load %arg22[%c0_82, %c0_83] : memref<1x32xf32, #tpu.memory_space<vmem>>, vector<1x32xf32>
    %c0_84 = arith.constant 0 : index
    %c0_85 = arith.constant 0 : index
    %175 = vector.load %arg23[%c0_84, %c0_85] : memref<1x32xf32, #tpu.memory_space<vmem>>, vector<1x32xf32>
    %176 = arith.addf %161, %173 : vector<16x32xf32>
    %cst_86 = arith.constant dense<0.000000e+00> : vector<16xf32>
    %177 = vector.multi_reduction <add>, %176, %cst_86 [1] : vector<16x32xf32> to vector<16xf32>
    %178 = vector.shape_cast %177 : vector<16xf32> to vector<16x1xf32>
    %cst_87 = arith.constant 3.200000e+01 : f32
    %179 = vector.broadcast %cst_87 : f32 to vector<16x1xf32>
    %180 = arith.divf %178, %179 : vector<16x1xf32>
    %181 = vector.broadcast %180 : vector<16x1xf32> to vector<16x32xf32>
    %182 = arith.subf %176, %181 : vector<16x32xf32>
    %183 = arith.mulf %182, %182 : vector<16x32xf32>
    %cst_88 = arith.constant dense<0.000000e+00> : vector<16xf32>
    %184 = vector.multi_reduction <add>, %183, %cst_88 [1] : vector<16x32xf32> to vector<16xf32>
    %185 = vector.shape_cast %184 : vector<16xf32> to vector<16x1xf32>
    %cst_89 = arith.constant 3.200000e+01 : f32
    %186 = vector.broadcast %cst_89 : f32 to vector<16x1xf32>
    %187 = arith.divf %185, %186 : vector<16x1xf32>
    %188 = vector.broadcast %180 : vector<16x1xf32> to vector<16x32xf32>
    %189 = arith.subf %176, %188 : vector<16x32xf32>
    %cst_90 = arith.constant 9.99999974E-6 : f32
    %190 = vector.broadcast %cst_90 : f32 to vector<16x1xf32>
    %191 = arith.addf %187, %190 : vector<16x1xf32>
    %192 = math.rsqrt %191 : vector<16x1xf32>
    %193 = vector.broadcast %192 : vector<16x1xf32> to vector<16x32xf32>
    %194 = arith.mulf %189, %193 : vector<16x32xf32>
    %195 = vector.broadcast %174 : vector<1x32xf32> to vector<16x32xf32>
    %196 = arith.mulf %194, %195 : vector<16x32xf32>
    %197 = vector.broadcast %175 : vector<1x32xf32> to vector<16x32xf32>
    %198 = arith.addf %196, %197 : vector<16x32xf32>
    %c0_91 = arith.constant 0 : index
    %c0_92 = arith.constant 0 : index
    %199 = vector.load %arg24[%c0_91, %c0_92] : memref<16x32xf32, #tpu.memory_space<vmem>>, vector<16x32xf32>
    tpu.vector_store %arg24[%c0_91, %c0_92], %198 {strides = array<i32>} : memref<16x32xf32, #tpu.memory_space<vmem>>, vector<16x32xf32>,
    return
  }
}

</mosaic_0001>

<bundles_post_ra>
// kernel: tile.9
= control target key start
LH: loop header
LB: loop body
LE: loop exit
PB: predicated region body
PF: predicated region fallthrough
CT: control target
= control target key end

     0   :  { %vm260_vm0 = vcmask 1047556   ;;  %vm262_vm1 = vcmask 64512   ;;  %vm281_vm2 = vcmask 130112   ;;  %v346_v47 = vmov 0   ;;  %s417_s0 = inlined_call_operand.vmem [shape: pred[2,8,2,8], index: 0, kind: input, shape index: {}]   ;;  %s418_s1 = inlined_call_operand.vmem [shape: pred[16,16], index: 1, kind: output, shape index: {}]  }
   0x1   :  { %v335_v0 = vld [vmem:[%s417_s0 + $0x7] sm:$0x1]  ;;  %v336_v1 = vld [vmem:[%s417_s0 + $0x6] sm:$0x1]  ;;  %v337_v2 = vld [vmem:[%s417_s0 + $0x5] sm:$0x1] }
   0x2   :  { %v144_v3 = vunpack.c.0.s8 %v335_v0  ;;  %v160_v4 = vunpack.c.0.s8 %v336_v1  ;;  %v176_v5 = vunpack.c.0.s8 %v337_v2  ;;  %v338_v6 = vld [vmem:[%s417_s0 + $0x4] sm:$0x1]  ;;  %v339_v7 = vld [vmem:[%s417_s0 + $0x3] sm:$0x1]  ;;  %v340_v8 = vld [vmem:[%s417_s0 + $0x2] sm:$0x1] }
   0x3   :  { %v192_v9 = vunpack.c.0.s8 %v338_v6  ;;  %v208_v10 = vunpack.c.0.s8 %v339_v7  ;;  %v224_v11 = vunpack.c.0.s8 %v340_v8  ;;  %v341_v12 = vld [vmem:[%s417_s0 + $0x1] sm:$0x1]  ;;  %v252_v13 = vld [vmem:[%s417_s0] sm:$0x1]  ;;  %v327_v16 = vld [vmem:[%s417_s0 + $0xf] sm:$0x1] }
   0x4   :  { %149 = vst [vmem:[#allocation1 + $0x38] sm:$0xf] %v144_v3  ;;  %165 = vst [vmem:[#allocation1 + $0x30] sm:$0xf] %v160_v4  ;;  %v239_v14 = vunpack.c.0.s8 %v341_v12  ;;  %v253_v15 = vunpack.c.0.s8 %v252_v13  ;;  %v328_v17 = vld [vmem:[%s417_s0 + $0xe] sm:$0x1]  ;;  %v16_v19 = vunpack.c.0.s8 %v327_v16 }
   0x5   :  { %181 = vst [vmem:[#allocation1 + $0x28] sm:$0xf] %v176_v5  ;;  %v329_v18 = vld [vmem:[%s417_s0 + $0xd] sm:$0x1]  ;;  %197 = vst [vmem:[#allocation1 + $0x20] sm:$0xf] %v192_v9  ;;  %v32_v20 = vunpack.c.0.s8 %v328_v17 }
   0x6   :  { %213 = vst [vmem:[#allocation1 + $0x18] sm:$0xf] %v208_v10  ;;  %229 = vst [vmem:[#allocation1 + $0x10] sm:$0xf] %v224_v11  ;;  %v48_v21 = vunpack.c.0.s8 %v329_v18  ;;  %v330_v22 = vld [vmem:[%s417_s0 + $0xc] sm:$0x1] }
   0x7   :  { %v331_v23 = vld [vmem:[%s417_s0 + $0xb] sm:$0x1]  ;;  %v332_v24 = vld [vmem:[%s417_s0 + $0xa] sm:$0x1]  ;;  %244 = vst [vmem:[#allocation1 + $0x8] sm:$0xf] %v239_v14  ;;  %v64_v25 = vunpack.c.0.s8 %v330_v22 }
   0x8   :  { %257 = vst [vmem:[#allocation1] sm:$0xf] %v253_v15  ;;  %v80_v26 = vunpack.c.0.s8 %v331_v23  ;;  %v96_v27 = vunpack.c.0.s8 %v332_v24  ;;  %v333_v28 = vld [vmem:[%s417_s0 + $0x9] sm:$0x1]  ;;  %v334_v29 = vld [vmem:[%s417_s0 + $0x8] sm:$0x1] }
   0x9   :  { %21 = vst [vmem:[#allocation1 + $0x78] sm:$0xf] %v16_v19  ;;  %37 = vst [vmem:[#allocation1 + $0x70] sm:$0xf] %v32_v20  ;;  %v112_v30 = vunpack.c.0.s8 %v333_v28  ;;  %v128_v31 = vunpack.c.0.s8 %v334_v29  ;;  %s345_s0 = smov 8  }
   0xa   :  { %53 = vst [vmem:[#allocation1 + $0x68] sm:$0xf] %v48_v21  ;;  %69 = vst [vmem:[#allocation1 + $0x60] sm:$0xf] %v64_v25 }
   0xb   :  { %85 = vst [vmem:[#allocation1 + $0x58] sm:$0xf] %v80_v26  ;;  %101 = vst [vmem:[#allocation1 + $0x50] sm:$0xf] %v96_v27 }
   0xc   :  { %117 = vst [vmem:[#allocation1 + $0x48] sm:$0xf] %v112_v30  ;;  %133 = vst [vmem:[#allocation1 + $0x40] sm:$0xf] %v128_v31 }
   0xd   :  { %v276_v32 = vld [vmem:[#allocation1 + $0x1] ss:$8 sm:$0xf0]   ;;  %v259_v33 = vld [vmem:[#allocation1] ss:$8 sm:$0xf0]  }
   0xf   :  { %v274_v34 = vld [vmem:[#allocation1 + $0x1] ss:$8 sm:$0xf]   ;;  %v258_v35 = vld [vmem:[#allocation1] ss:$8 sm:$0xf]  }
  0x10   :  { %v278_v36 = vsel %vm260_vm0, %v276_v32, %v274_v34  ;;  %v261_v37 = vsel %vm260_vm0, %v259_v33, %v258_v35 }
  0x11   :  { %279 = vrot.lane.b32.xlu0 %v278_v36, %s345_s0  ;;  %v286_v38 = vld [vmem:[#allocation1 + $0x41] ss:$8 sm:$0xf0]   ;;  %263 = vst.msk [vmem:[#allocation0] sm:$0xff] %vm262_vm1, %v261_v37  }
  0x12   :  { %v267_v39 = vld [vmem:[#allocation1 + $0x40] ss:$8 sm:$0xf0]  }
  0x13   :  { %v284_v40 = vld [vmem:[#allocation1 + $0x41] ss:$8 sm:$0xf]   ;;  %v265_v41 = vld [vmem:[#allocation1 + $0x40] ss:$8 sm:$0xf]  }
  0x14   :  { %v288_v42 = vsel %vm260_vm0, %v286_v38, %v284_v40  ;;  %v269_v43 = vsel %vm260_vm0, %v267_v39, %v265_v41 }
  0x15   :  { %272 = vst.msk [vmem:[#allocation0 + $0x8] sm:$0xff] %vm262_vm1, %v269_v43   ;;  %289 = vrot.lane.b32.xlu0 %v288_v42, %s345_s0 }
  0x83   :  { %v280_v44 = vpop.permute.xlu0 %279  }
  0x84   :  { %282 = vst.msk [vmem:[#allocation0] sm:$0xff] %vm281_vm2, %v280_v44  }
  0x87   :  { %v290_v45 = vpop.permute.xlu0 %289  }
  0x88   :  { %293 = vst.msk [vmem:[#allocation0 + $0x8] sm:$0xff] %vm281_vm2, %v290_v45  }
  0x8b   :  { %v299_v46 = vld [vmem:[#allocation0] sm:$0xff] }
  0x8c   :  { %v302_v48 = vpack.c.b16 %v346_v47, %v299_v46 }
  0x8e   :  { %v303_v49 = vpack.c.b8 %v346_v47, %v302_v48 }
  0x8f   :  { %v306_v50 = vld [vmem:[#allocation0 + $0x8] sm:$0xff] }
  0x90   :  { %304 = vst [vmem:[%s418_s1] sm:$0x3] %v303_v49  ;;  %v310_v51 = vpack.c.b16 %v346_v47, %v306_v50 }
  0x92   :  { %v311_v52 = vpack.c.b8 %v346_v47, %v310_v51 }
  0x94   :  { %342 = vst [vmem:[%s418_s1 + $0x2] sm:$0x3] %v311_v52 }

// kernel: tile.8
= control target key start
LH: loop header
LB: loop body
LE: loop exit
PB: predicated region body
PF: predicated region fallthrough
CT: control target
= control target key end

     0   :  { %v157_v10 = vmov 0   ;;  %s222_s0 = inlined_call_operand.vmem [shape: pred[8,8], index: 0, kind: input, shape index: {}]   ;;  %s223_s1 = inlined_call_operand.vmem [shape: pred[2,8,2,8], index: 1, kind: output, shape index: {}]  }
   0x1   :  { %v4_v0 = vld [vmem:[%s222_s0] ss:$0 sm:$0xff]  ;;  %v143_v1 = vld [vmem:[%s222_s0 + $0x1] ss:$0 sm:$0xff] }
   0x2   :  { %v7_v2 = vand.u32 255, %v4_v0  ;;  %v21_v3 = vshra.s32 %v4_v0, 8  ;;  %v37_v4 = vshra.s32 %v4_v0, 16  ;;  %v140_v5 = vshrl.u32 %v4_v0, 24 }
   0x3   :  { %v71_v6 = vand.u32 255, %v143_v1  ;;  %v87_v7 = vshra.s32 %v143_v1, 8  ;;  %v104_v8 = vshra.s32 %v143_v1, 16  ;;  %v153_v9 = vshrl.u32 %v143_v1, 24 }
   0x4   :  { %v8_v11 = vpack.c.b16 %v157_v10, %v7_v2  ;;  %v22_v12 = vand.u32 255, %v21_v3  ;;  %v38_v13 = vand.u32 255, %v37_v4  ;;  %v56_v14 = vpack.c.b16 %v157_v10, %v140_v5 }
   0x5   :  { %v73_v15 = vpack.c.b16 %v157_v10, %v71_v6  ;;  %v88_v16 = vand.u32 255, %v87_v7  ;;  %v105_v17 = vand.u32 255, %v104_v8  ;;  %v124_v18 = vpack.c.b16 %v157_v10, %v153_v9 }
   0x6   :  { %v9_v19 = vpack.c.b8 %v157_v10, %v8_v11  ;;  %v24_v20 = vpack.c.b16 %v157_v10, %v22_v12  ;;  %v40_v21 = vpack.c.b16 %v157_v10, %v38_v13  ;;  %v57_v22 = vpack.c.b8 %v157_v10, %v56_v14 }
   0x7   :  { %v74_v23 = vpack.c.b8 %v157_v10, %v73_v15  ;;  %v90_v24 = vpack.c.b16 %v157_v10, %v88_v16  ;;  %v107_v25 = vpack.c.b16 %v157_v10, %v105_v17  ;;  %v125_v26 = vpack.c.b8 %v157_v10, %v124_v18 }
   0x8   :  { %12 = vst [vmem:[%s223_s1] sm:$0x1] %v9_v19  ;;  %135 = vst [vmem:[%s223_s1 + $0x8] sm:$0x1] %v9_v19  ;;  %v25_v27 = vpack.c.b8 %v157_v10, %v24_v20  ;;  %v41_v28 = vpack.c.b8 %v157_v10, %v40_v21 }
   0x9   :  { %141 = vst [vmem:[%s223_s1 + $0x3] sm:$0x1] %v57_v22  ;;  %142 = vst [vmem:[%s223_s1 + $0xb] sm:$0x1] %v57_v22  ;;  %v91_v29 = vpack.c.b8 %v157_v10, %v90_v24  ;;  %v108_v30 = vpack.c.b8 %v157_v10, %v107_v25 }
   0xa   :  { %144 = vst [vmem:[%s223_s1 + $0x4] sm:$0x1] %v74_v23  ;;  %145 = vst [vmem:[%s223_s1 + $0xc] sm:$0x1] %v74_v23 }
   0xb   :  { %154 = vst [vmem:[%s223_s1 + $0x7] sm:$0x1] %v125_v26  ;;  %155 = vst [vmem:[%s223_s1 + $0xf] sm:$0x1] %v125_v26 }
   0xc   :  { %136 = vst [vmem:[%s223_s1 + $0x1] sm:$0x1] %v25_v27  ;;  %137 = vst [vmem:[%s223_s1 + $0x9] sm:$0x1] %v25_v27 }
   0xd   :  { %138 = vst [vmem:[%s223_s1 + $0x2] sm:$0x1] %v41_v28  ;;  %139 = vst [vmem:[%s223_s1 + $0xa] sm:$0x1] %v41_v28 }
   0xe   :  { %147 = vst [vmem:[%s223_s1 + $0x5] sm:$0x1] %v91_v29  ;;  %148 = vst [vmem:[%s223_s1 + $0xd] sm:$0x1] %v91_v29 }
   0xf   :  { %150 = vst [vmem:[%s223_s1 + $0x6] sm:$0x1] %v108_v30  ;;  %151 = vst [vmem:[%s223_s1 + $0xe] sm:$0x1] %v108_v30 }

// kernel: decoder_layer.1
= control target key start
LH: loop header
LB: loop body
LE: loop exit
PB: predicated region body
PF: predicated region fallthrough
CT: control target
= control target key end

     0   :  { %s2515_s0 = inlined_call_operand.vmem [shape: f32[16,32], index: 0, kind: input, shape index: {}]   ;;  %s2516_s1 = inlined_call_operand.vmem [shape: f32[16,32], index: 1, kind: input, shape index: {}]   ;;  %s2517_s2 = inlined_call_operand.vmem [shape: f32[16,16], index: 2, kind: input, shape index: {}]   ;;  %s2518_s3 = inlined_call_operand.vmem [shape: f32[16,16], index: 3, kind: input, shape index: {}]   ;;  %s2519_s4 = inlined_call_operand.vmem [shape: f32[32,96], index: 4, kind: input, shape index: {}]   ;;  %s2520_s5 = inlined_call_operand.vmem [shape: f32[1,96], index: 5, kind: input, shape index: {}]   ;;  %s2521_s6 = inlined_call_operand.vmem [shape: f32[32,32], index: 6, kind: input, shape index: {}]   ;;  %s2522_s7 = inlined_call_operand.vmem [shape: f32[1,32], index: 7, kind: input, shape index: {}]   ;;  %s2523_s8 = inlined_call_operand.vmem [shape: f32[1,32], index: 8, kind: input, shape index: {}]   ;;  %s2524_s9 = inlined_call_operand.vmem [shape: f32[1,32], index: 9, kind: input, shape index: {}]   ;;  %s2525_s10 = inlined_call_operand.vmem [shape: f32[32,32], index: 10, kind: input, shape index: {}]   ;;  %s2526_s11 = inlined_call_operand.vmem [shape: f32[1,32], index: 11, kind: input, shape index: {}]   ;;  %s2527_s12 = inlined_call_operand.vmem [shape: f32[32,64], index: 12, kind: input, shape index: {}]   ;;  %s2528_s13 = inlined_call_operand.vmem [shape: f32[1,64], index: 13, kind: input, shape index: {}]   ;;  %s2529_s14 = inlined_call_operand.vmem [shape: f32[32,32], index: 14, kind: input, shape index: {}]   ;;  %s2530_s15 = inlined_call_operand.vmem [shape: f32[1,32], index: 15, kind: input, shape index: {}]   ;;  %s2531_s16 = inlined_call_operand.vmem [shape: f32[1,32], index: 16, kind: input, shape index: {}]   ;;  %s2532_s17 = inlined_call_operand.vmem [shape: f32[1,32], index: 17, kind: input, shape index: {}]   ;;  %s2533_s18 = inlined_call_operand.vmem [shape: f32[32,64], index: 18, kind: input, shape index: {}]   ;;  %s2534_s19 = inlined_call_operand.vmem [shape: f32[1,64], index: 19, kind: input, shape index: {}]   ;;  %s2535_s20 = inlined_call_operand.vmem [shape: f32[64,32], index: 20, kind: input, shape index: {}]   ;;  %s2536_s21 = inlined_call_operand.vmem [shape: f32[1,32], index: 21, kind: input, shape index: {}]   ;;  %s2537_s22 = inlined_call_operand.vmem [shape: f32[1,32], index: 22, kind: input, shape index: {}]   ;;  %s2538_s23 = inlined_call_operand.vmem [shape: f32[1,32], index: 23, kind: input, shape index: {}]   ;;  %s2539_s24 = inlined_call_operand.hbm [shape: f32[16,32], index: 24, kind: output, shape index: {}]  }
   0x1   :  { %2546 = sst [smem:[#allocation5_spill]] %s2515_s0 }
   0x2   :  { %2547 = sst [smem:[#allocation6_spill]] %s2516_s1 }
   0x3   :  { %2548 = sst [smem:[#allocation7_spill]] %s2517_s2 }
   0x4   :  { %2549 = sst [smem:[#allocation8_spill]] %s2518_s3 }
   0x5   :  { %2550 = sst [smem:[#allocation9_spill]] %s2519_s4 }
   0x6   :  { %2551 = sst [smem:[#allocation10_spill]] %s2520_s5 }
   0x7   :  { %2552 = sst [smem:[#allocation11_spill]] %s2521_s6 }
   0x8   :  { %2553 = sst [smem:[#allocation12_spill]] %s2522_s7 }
   0x9   :  { %2554 = sst [smem:[#allocation13_spill]] %s2523_s8 }
   0xa   :  { %s2555_s27 = sld [smem:[#allocation9_spill]]  ;;  %vm93_vm0 = vcmask 261120  }
   0xb   :  { %s2556_s0 = sld [smem:[#allocation5_spill]] }
  0x10   :  { %v85_v0 = vld [vmem:[%s2555_s27 + $0x18] sm:$0xff]  ;;  %v84_v1 = vld [vmem:[%s2555_s27 + $0x10] sm:$0xff]  ;;  %v83_v3 = vld [vmem:[%s2555_s27 + $0x8] sm:$0xff] }
  0x11   :  { %1859 = vmatprep.subr.mxu1 %v85_v0  ;;  %v2218_v2 = vld [vmem:[%s2556_s0] sm:$0xff] }
  0x12   :  { %1860 = vmatpush3.msra.mxu1 %v85_v0  ;;  %1867 = vmatprep.mubr.msk.f32.mxu1 %vm93_vm0, %v2218_v2 }
  0x13   :  { %29 = vsyncpa [#allocation3], 0  ;;  %1861 = vmatprep.subr.mxu1 %v84_v1  ;;  %v82_v4 = vld [vmem:[%s2555_s27] sm:$0xff]  ;;  %v2231_v5 = vld [vmem:[%s2556_s0 + $0x8] sm:$0xff]  ;;  %s2557_s26 = sld [smem:[#allocation10_spill]]  ;;  %vm185_vm1 = vcmask 130048  }
  0x14   :  { %1862 = vmatpush3.msra.mxu1 %v84_v1  ;;  %s2075_s27 = smov 80   ;;  %s2076_s28 = smov 96   ;;  %vm1584_vm2 = vcmask 523264  }
  0x15   :  { %1863 = vmatprep.subr.mxu1 %v83_v3  ;;  %s2077_s6 = smov 112   ;;  %s2558_s0 = sld [smem:[#allocation7_spill]] }
  0x16   :  { %1864 = vmatpush3.msra.mxu1 %v83_v3  ;;  %s2078_s3 = smov 64   ;;  %s2079_s25 = smov 48  }
  0x17   :  { %1865 = vmatprep.subr.mxu1 %v82_v4  ;;  %s2559_s1 = sld [smem:[#allocation11_spill]]  ;;  %s2080_s30 = smov 16  }
  0x18   :  { %1866 = vmatpush3.msra.mxu1 %v82_v4  ;;  %s2560_s8 = sld [smem:[#allocation12_spill]]  ;;  %s2081_s2 = smov [#allocation2]  }
  0x19   :  { %1868 = vmatmul.mubr.msk.f32.vlgmr.msra.gmra.mxu1 %vm93_vm0, %v2231_v5  ;;  %v1730_v6 = vld [vmem:[%s2557_s26] ss:$0 sm:$0xff]  ;;  %s2562_s4 = sld [smem:[#allocation13_spill]] }
  0x1a   :  { %s2563_s29 = sld [smem:[#allocation8_spill]] }
  0x1b   :  { %v176_v17 = vld [vmem:[%s2558_s0 + $0x8] sm:$0xff]  ;;  %v175_v18 = vld [vmem:[%s2558_s0] sm:$0xff] }
  0x1c   :  { %v178_v19 = vmul.f32 -1e+09, %v176_v17  ;;  %v177_v22 = vmul.f32 -1e+09, %v175_v18 }
  0xd9   :  { %v1869_v7 = vpop.f32.mrf.mxu1 }
  0xda   :  { %v2238_v8 = vadd.f32 %v1869_v7, %v1730_v6 }
  0xdb   :  { %v166_v9 = vpop.f32.mrf.mxu1 }
  0xdc   :  { %v2240_v10 = vadd.f32 %v1730_v6, %v166_v9  ;;  %388 = vrot.lane.b32.xlu1 %v2238_v8, %s2075_s27  ;;  %183 = vrot.lane.b32.xlu0 %v2238_v8, %s2076_s28 }
  0xde   :  { %1874 = vmatprep.mubr.msk.f32.mxu1 %vm185_vm1, %v2240_v10 }
  0xe0   :  { %386 = vrot.lane.b32.xlu1 %v2240_v10, %s2075_s27  ;;  %181 = vrot.lane.b32.xlu0 %v2240_v10, %s2076_s28 }
  0xe4   :  { %384 = vrot.lane.b32.xlu1 %v2238_v8, %s2077_s6  ;;  %382 = vrot.lane.b32.xlu0 %v2240_v10, %s2077_s6 }
 0x14e   :  { %v184_v11 = vpop.permute.xlu0 %183  ;;  %v389_v12 = vpop.permute.xlu1 %388 }
 0x14f   :  { %1870 = vmatprep.subr.msk.mxu1 %vm185_vm1, %v184_v11 }
 0x150   :  { %1871 = vmatpush3.xpose.msk.msra.mxu1 %vm185_vm1, %v184_v11  ;;  %v599_v11 = vld [vmem:[%s2559_s1 + $0x18] sm:$0xff] }
 0x152   :  { %v182_v13 = vpop.permute.xlu0 %181  ;;  %v387_v15 = vpop.permute.xlu1 %386 }
 0x153   :  { %1872 = vmatprep.subr.msk.mxu1 %vm185_vm1, %v182_v13 }
 0x154   :  { %1873 = vmatpush3.xpose.msk.msra.mxu1 %vm185_vm1, %v182_v13  ;;  %v597_v13 = vld [vmem:[%s2559_s1 + $0x8] sm:$0xff] }
 0x155   :  { %1884 = vmatprep.subr.msk.mxu1 %vm185_vm1, %v389_v12 }
 0x156   :  { %v383_v14 = vpop.permute.xlu0 %382  ;;  %v385_v16 = vpop.permute.xlu1 %384 }
 0x157   :  { %1875 = vmatmul.mubr.msk.f32.vlgmr.msra.gmra.mxu1 %vm185_vm1, %v2238_v8 }
 0x158   :  { %1885 = vmatpush3.xpose.msk.msra.mxu1 %vm185_vm1, %v389_v12  ;;  %1888 = vmatprep.mubr.msk.f32.mxu1 %vm185_vm1, %v383_v14  ;;  %v598_v12 = vld [vmem:[%s2559_s1 + $0x10] sm:$0xff]  ;;  %v596_v14 = vld [vmem:[%s2559_s1] sm:$0xff] }
 0x159   :  { %1886 = vmatprep.subr.msk.mxu1 %vm185_vm1, %v387_v15 }
 0x15c   :  { %1887 = vmatpush3.xpose.msk.msra.mxu1 %vm185_vm1, %v387_v15 }
 0x15f   :  { %1889 = vmatmul.mubr.msk.f32.vlgmr.msra.gmra.mxu1 %vm185_vm1, %v385_v16 }
 0x217   :  { %v1876_v20 = vpop.f32.mrf.mxu1 }
 0x218   :  { %v270_v21 = vmul.f32 0.25, %v1876_v20 }
 0x219   :  { %v260_v23 = vpop.f32.mrf.mxu1 }
 0x21a   :  { %v269_v24 = vmul.f32 0.25, %v260_v23  ;;  %v272_v25 = vadd.f32 %v270_v21, %v178_v19  ;;  %v1745_v23 = vld [vmem:[%s2560_s8] ss:$0 sm:$0xff] }
 0x21c   :  { %v276_v26 = vsel %vm185_vm1, %v272_v25, -inf  ;;  %v271_v27 = vadd.f32 %v269_v24, %v177_v22 }
 0x21d   :  { %277 = vmax.xlane.f32.xlu1 %v276_v26 }
 0x21e   :  { %v273_v28 = vsel %vm185_vm1, %v271_v27, -inf }
 0x21f   :  { %v1890_v29 = vpop.f32.mrf.mxu1  ;;  %274 = vmax.xlane.f32.xlu0 %v273_v28 }
 0x220   :  { %v474_v31 = vmul.f32 0.25, %v1890_v29 }
 0x221   :  { %v464_v30 = vpop.f32.mrf.mxu1 }
 0x222   :  { %v473_v32 = vmul.f32 0.25, %v464_v30  ;;  %v476_v35 = vadd.f32 %v474_v31, %v178_v19 }
 0x224   :  { %v475_v33 = vadd.f32 %v473_v32, %v177_v22  ;;  %v480_v36 = vsel %vm185_vm1, %v476_v35, -inf }
 0x226   :  { %v477_v34 = vsel %vm185_vm1, %v475_v33, -inf }
 0x227   :  { %478 = vmax.xlane.f32.xlu0 %v477_v34 }
 0x22b   :  { %481 = vmax.xlane.f32.xlu0 %v480_v36 }
 0x22e   :  { %297 = vrot.lane.b32.xlu1 %v2238_v8, %s2078_s3 }
 0x2a6   :  { %v278_v37 = vpop.xlane.xlu1 %277 }
 0x2a7   :  { %v280_v38 = vsub.f32 %v272_v25, %v278_v37 }
 0x2a8   :  { %v275_v39 = vpop.xlane.xlu0 %274 }
 0x2a9   :  { %v283_v40 = vmul.f32 1.442695, %v280_v38  ;;  %v279_v41 = vsub.f32 %v271_v27, %v275_v39 }
 0x2aa   :  { %v298_v42 = vpop.permute.xlu1 %297 }
 0x2ab   :  { %2009 = vpow2.f32 %v283_v40  ;;  %v281_v43 = vmul.f32 1.442695, %v279_v41  ;;  %1877 = vmatprep.subr.mxu0 %v298_v42  ;;  %v829_v41 = vld [vmem:[%s2527_s12 + $0x10] sm:$0xff] }
 0x2ac   :  { %1878 = vmatpush3.msra.mxu0 %v298_v42  ;;  %v738_v42 = vld [vmem:[%s2525_s10 + $0x18] sm:$0xff] }
 0x2ad   :  { %2011 = vpow2.f32 %v281_v43  ;;  %1909 = vmatprep.subr.mxu1 %v738_v42 }
 0x2ae   :  { %1910 = vmatpush3.msra.mxu1 %v738_v42 }
 0x2b0   :  { %v479_v44 = vpop.xlane.xlu0 %478 }
 0x2b1   :  { %v483_v54 = vsub.f32 %v475_v33, %v479_v44  ;;  %v828_v44 = vld [vmem:[%s2527_s12 + $0x8] sm:$0xff] }
 0x2b3   :  { %v485_v55 = vmul.f32 1.442695, %v483_v54 }
 0x2b4   :  { %v482_v45 = vpop.xlane.xlu0 %481 }
 0x2b5   :  { %v484_v46 = vsub.f32 %v476_v35, %v482_v45  ;;  %v737_v45 = vld [vmem:[%s2525_s10 + $0x10] sm:$0xff] }
 0x2b6   :  { %1911 = vmatprep.subr.mxu1 %v737_v45 }
 0x2b7   :  { %v487_v47 = vmul.f32 1.442695, %v484_v46  ;;  %v827_v46 = vld [vmem:[%s2527_s12] sm:$0xff]  ;;  %1912 = vmatpush3.msra.mxu1 %v737_v45 }
 0x2b8   :  { %v2010_v48 = vpop.eup %2009 }
 0x2b9   :  { %2013 = vpow2.f32 %v487_v47  ;;  %v288_v49 = vsel %vm185_vm1, %v2010_v48, 0.0  ;;  %v736_v47 = vld [vmem:[%s2525_s10 + $0x8] sm:$0xff] }
 0x2ba   :  { %v2012_v50 = vpop.eup %2011  ;;  %289 = vadd.xlane.f32.xlu0 %v288_v49  ;;  %2015 = vpow2.f32 %v485_v55  ;;  %1913 = vmatprep.subr.mxu1 %v736_v47  ;;  %v735_v49 = vld [vmem:[%s2525_s10] sm:$0xff] }
 0x2bb   :  { %v285_v51 = vsel %vm185_vm1, %v2012_v50, 0.0  ;;  %1914 = vmatpush3.msra.mxu1 %v736_v47 }
 0x2bc   :  { %286 = vadd.xlane.f32.xlu1 %v285_v51  ;;  %1915 = vmatprep.subr.mxu1 %v735_v49 }
 0x2bd   :  { %1916 = vmatpush3.msra.mxu1 %v735_v49 }
 0x2c6   :  { %v2014_v52 = vpop.eup %2013 }
 0x2c7   :  { %v492_v53 = vsel %vm185_vm1, %v2014_v52, 0.0  ;;  %v2016_v56 = vpop.eup %2015 }
 0x2c8   :  { %493 = vadd.xlane.f32.xlu0 %v492_v53  ;;  %v489_v57 = vsel %vm185_vm1, %v2016_v56, 0.0 }
 0x2cd   :  { %501 = vrot.lane.b32.xlu1 %v2238_v8, %s2079_s25 }
 0x2de   :  { %295 = vrot.lane.b32.xlu0 %v2240_v10, %s2078_s3  ;;  %s2561_s3 = sld [smem:[#allocation6_spill]] }
 0x2e4   :  { %v80_v43 = vld [vmem:[%s2561_s3] sm:$0xff] }
 0x2f1   :  { %490 = vadd.xlane.f32.xlu1 %v489_v57  ;;  %v1748_v57 = vld [vmem:[%s2562_s4] ss:$0 sm:$0xff] }
 0x302   :  { %499 = vrot.lane.b32.xlu1 %v2240_v10, %s2079_s25 }
 0x343   :  { %v290_v58 = vpop.xlane.xlu0 %289 }
 0x344   :  { %2017 = vrcp.f32 %v290_v58 }
 0x345   :  { %v287_v59 = vpop.xlane.xlu1 %286 }
 0x346   :  { %2019 = vrcp.f32 %v287_v59  ;;  %v1749_v59 = vld [vmem:[%s2524_s9] ss:$0 sm:$0xff] }
 0x349   :  { %v502_v3 = vpop.permute.xlu1 %501 }
 0x351   :  { %v494_v60 = vpop.xlane.xlu0 %493  ;;  %v2018_v61 = vpop.eup %2017 }
 0x352   :  { %v294_v1 = vmul.f32 %v2018_v61, %v2010_v48  ;;  %2021 = vrcp.f32 %v494_v60  ;;  %v81_v48 = vld [vmem:[%s2561_s3 + $0x8] sm:$0xff] }
 0x353   :  { %v2020_v62 = vpop.eup %2019 }
 0x354   :  { %v293_v63 = vmul.f32 %v2020_v62, %v2012_v50 }
 0x355   :  { %v296_v0 = vpop.permute.xlu0 %295 }
 0x356   :  { %1879 = vmatprep.subr.mxu0 %v296_v0  ;;  %1881 = vmatprep.mubr.msk.f32.mxu0 %vm185_vm1, %v293_v63 }
 0x357   :  { %1880 = vmatpush3.msra.mxu0 %v296_v0 }
 0x358   :  { %1882 = vmatmul.mubr.msk.f32.vlgmr.msra.gmra.mxu0 %vm185_vm1, %v294_v1  ;;  %1891 = vmatprep.subr.mxu0 %v502_v3 }
 0x359   :  { %1892 = vmatpush3.msra.mxu0 %v502_v3  ;;  %v1753_v3 = vld [vmem:[%s2528_s13] ss:$0 sm:$0xff] }
 0x35f   :  { %v2022_v7 = vpop.eup %2021 }
 0x360   :  { %v498_v10 = vmul.f32 %v2022_v7, %v2014_v52 }
 0x37a   :  { %v491_v4 = vpop.xlane.xlu1 %490 }
 0x37b   :  { %2023 = vrcp.f32 %v491_v4 }
 0x37e   :  { %v500_v6 = vpop.permute.xlu1 %499 }
 0x37f   :  { %1893 = vmatprep.subr.mxu0 %v500_v6 }
 0x380   :  { %1894 = vmatpush3.msra.mxu0 %v500_v6 }
 0x381   :  { %1898 = vmatprep.subr.mxu0 %v599_v11 }
 0x388   :  { %v2024_v8 = vpop.eup %2023 }
 0x389   :  { %v497_v9 = vmul.f32 %v2024_v8, %v2016_v56 }
 0x38b   :  { %1895 = vmatprep.mubr.msk.f32.mxu0 %vm185_vm1, %v497_v9 }
 0x38c   :  { %1896 = vmatmul.mubr.msk.f32.vlgmr.msra.gmra.mxu0 %vm185_vm1, %v498_v10 }
 0x38d   :  { %1899 = vmatpush3.msra.mxu0 %v599_v11  ;;  %v1750_v11 = vld [vmem:[%s2526_s11] ss:$0 sm:$0xff] }
 0x38e   :  { %1900 = vmatprep.subr.mxu0 %v598_v12 }
 0x38f   :  { %1901 = vmatpush3.msra.mxu0 %v598_v12 }
 0x390   :  { %1902 = vmatprep.subr.mxu0 %v597_v13 }
 0x391   :  { %1903 = vmatpush3.msra.mxu0 %v597_v13 }
 0x392   :  { %1904 = vmatprep.subr.mxu0 %v596_v14 }
 0x393   :  { %1905 = vmatpush3.msra.mxu0 %v596_v14 }
 0x418   :  { %v1883_v15 = vpop.f32.mrf.mxu0 }
 0x41a   :  { %v373_v16 = vpop.f32.mrf.mxu0 }
 0x44c   :  { %v1897_v17 = vpop.f32.mrf.mxu0 }
 0x44d   :  { %590 = vrot.lane.b32.xlu1 %v1897_v17, %s2080_s30 }
 0x44e   :  { %v577_v18 = vpop.f32.mrf.mxu0 }
 0x44f   :  { %588 = vrot.lane.b32.xlu0 %v577_v18, %s2080_s30  ;;  %v920_v18 = vld [vmem:[%s2563_s29 + $0x8] sm:$0xff] }
 0x4bf   :  { %v591_v19 = vpop.permute.xlu1 %590 }
 0x4c0   :  { %v595_v22 = vsel %vm185_vm1, %v1883_v15, %v591_v19  ;;  %v919_v19 = vld [vmem:[%s2563_s29] sm:$0xff]  ;;  %s1719_s29 = sshll.u32 %s2081_s2, 4  ;;  %s1720_s29 = int_to_ptr.vmem [resolvable:$true] %s1719_s29 }
 0x4c1   :  { %v589_v20 = vpop.permute.xlu0 %588  ;;  %s2053_s0 = scalar_lea.vmem %s1720_s29, 256  ;;  %p2058_p1 = scmp.lt.s32.totalorder %s1720_s29, %s1720_s29 }
 0x4c2   :  { %v594_v21 = vsel %vm185_vm1, %v373_v16, %v589_v20  ;;  %v922_v20 = vmul.f32 -1e+09, %v920_v18  ;;  %p2054_p0 = scmp.ne.s32.totalorder %s1720_s29, %s2053_s0  ;;  %p2059_p2 = scmp.lt.s32.totalorder %s2053_s0, %s2053_s0 }
 0x4c3   :  { %1906 = vmatprep.mubr.msk.f32.mxu0 %vm93_vm0, %v594_v21 }
 0x4c4   :  { %1907 = vmatmul.mubr.msk.f32.vlgmr.msra.gmra.mxu0 %vm93_vm0, %v595_v22  ;;  %p2060_p3 = por %p2059_p2, %p2058_p1 }
 0x4c5   :  { %1928 = vmatprep.mubr.msk.f32.mxu0 %vm93_vm0, %v80_v43 }
 0x4c6   :  { %p2061_p4 = pnand %p2060_p3, %p2054_p0 }
 0x584   :  { %v1908_v24 = vpop.f32.mrf.mxu0 }
 0x585   :  { %v685_v25 = vadd.f32 %v1908_v24, %v1745_v23 }
 0x586   :  { %v679_v26 = vpop.f32.mrf.mxu0 }
 0x587   :  { %v680_v27 = vadd.f32 %v1745_v23, %v679_v26  ;;  %v691_v28 = vadd.f32 %v685_v25, %v2231_v5  ;;  %v921_v23 = vmul.f32 -1e+09, %v919_v19 }
 0x589   :  { %v695_v29 = vsel %vm93_vm0, %v691_v28, 0.0  ;;  %v690_v30 = vadd.f32 %v680_v27, %v2218_v2  ;;  %v830_v2 = vld [vmem:[%s2527_s12 + $0x18] sm:$0xff] }
 0x58a   :  { %696 = vadd.xlane.f32.xlu1 %v695_v29  ;;  %1920 = vmatprep.subr.mxu0 %v830_v2 }
 0x58b   :  { %v692_v31 = vsel %vm93_vm0, %v690_v30, 0.0  ;;  %1921 = vmatpush3.msra.mxu0 %v830_v2 }
 0x58c   :  { %693 = vadd.xlane.f32.xlu0 %v692_v31  ;;  %1922 = vmatprep.subr.mxu0 %v829_v41 }
 0x58d   :  { %1923 = vmatpush3.msra.mxu0 %v829_v41 }
 0x58e   :  { %1924 = vmatprep.subr.mxu0 %v828_v44 }
 0x58f   :  { %1925 = vmatpush3.msra.mxu0 %v828_v44 }
 0x590   :  { %1926 = vmatprep.subr.mxu0 %v827_v46 }
 0x591   :  { %1927 = vmatpush3.msra.mxu0 %v827_v46 }
 0x592   :  { %1929 = vmatmul.mubr.msk.f32.vlgmr.msra.gmra.mxu0 %vm93_vm0, %v81_v48 }
 0x613   :  { %v697_v32 = vpop.xlane.xlu1 %696 }
 0x614   :  { %v700_v33 = vmul.f32 0.03125, %v697_v32 }
 0x615   :  { %v694_v34 = vpop.xlane.xlu0 %693 }
 0x616   :  { %v699_v35 = vmul.f32 0.03125, %v694_v34  ;;  %v702_v36 = vsub.f32 %v691_v28, %v700_v33 }
 0x618   :  { %v701_v37 = vsub.f32 %v690_v30, %v699_v35  ;;  %v704_v40 = vmul.f32 %v702_v36, %v702_v36 }
 0x61a   :  { %v703_v38 = vmul.f32 %v701_v37, %v701_v37  ;;  %v708_v5 = vsel %vm93_vm0, %v704_v40, 0.0 }
 0x61c   :  { %v705_v39 = vsel %vm93_vm0, %v703_v38, 0.0 }
 0x61d   :  { %706 = vadd.xlane.f32.xlu0 %v705_v39 }
 0x621   :  { %709 = vadd.xlane.f32.xlu0 %v708_v5 }
 0x652   :  { %v1930_v4 = vpop.f32.mrf.mxu0 }
 0x653   :  { %v2368_v6 = vadd.f32 %v1930_v4, %v1753_v3 }
 0x654   :  { %v910_v7 = vpop.f32.mrf.mxu0 }
 0x655   :  { %1129 = vrot.lane.b32.xlu1 %v2368_v6, %s2077_s6  ;;  %1931 = vmatprep.subr.msk.mxu1 %vm185_vm1, %v2368_v6  ;;  %v2374_v8 = vadd.f32 %v1753_v3, %v910_v7 }
 0x657   :  { %1127 = vrot.lane.b32.xlu0 %v2374_v8, %s2077_s6 }
 0x6a6   :  { %v707_v50 = vpop.xlane.xlu0 %706 }
 0x6a7   :  { %v711_v51 = vmul.f32 0.03125, %v707_v50 }
 0x6a9   :  { %v713_v52 = vadd.f32 1e-05, %v711_v51 }
 0x6aa   :  { %v710_v53 = vpop.xlane.xlu0 %709 }
 0x6ab   :  { %2025 = vrsqrt.f32 %v713_v52  ;;  %v712_v54 = vmul.f32 0.03125, %v710_v53 }
 0x6ad   :  { %v714_v55 = vadd.f32 1e-05, %v712_v54 }
 0x6af   :  { %2027 = vrsqrt.f32 %v714_v55 }
 0x6b8   :  { %v2026_v56 = vpop.eup %2025 }
 0x6b9   :  { %v717_v58 = vmul.f32 %v2026_v56, %v701_v37 }
 0x6bb   :  { %v725_v60 = vmul.f32 %v1748_v57, %v717_v58 }
 0x6bc   :  { %v2028_v61 = vpop.eup %2027 }
 0x6bd   :  { %v718_v62 = vmul.f32 %v2028_v61, %v702_v36  ;;  %v2357_v63 = vadd.f32 %v1749_v59, %v725_v60 }
 0x6bf   :  { %v726_v0 = vmul.f32 %v1748_v57, %v718_v62  ;;  %1917 = vmatprep.mubr.msk.f32.mxu1 %vm93_vm0, %v2357_v63 }
 0x6c1   :  { %v2361_v1 = vadd.f32 %v1749_v59, %v726_v0 }
 0x6c3   :  { %1918 = vmatmul.mubr.msk.f32.vlgmr.msra.gmra.mxu1 %vm93_vm0, %v2361_v1 }
 0x6c4   :  { %1932 = vmatpush3.xpose.msk.msra.mxu1 %vm185_vm1, %v2368_v6 }
 0x6c5   :  { %1933 = vmatprep.subr.msk.mxu1 %vm185_vm1, %v2374_v8 }
 0x6c7   :  { %v1130_v9 = vpop.permute.xlu1 %1129 }
 0x6c8   :  { %1934 = vmatpush3.xpose.msk.msra.mxu1 %vm185_vm1, %v2374_v8 }
 0x6c9   :  { %1945 = vmatprep.subr.msk.mxu1 %vm185_vm1, %v1130_v9  ;;  %v1128_v15 = vpop.permute.xlu0 %1127 }
 0x783   :  { %v1919_v10 = vpop.f32.mrf.mxu1 }
 0x784   :  { %v824_v14 = vadd.f32 %v1919_v10, %v1750_v11 }
 0x785   :  { %v818_v12 = vpop.f32.mrf.mxu1 }
 0x786   :  { %v819_v13 = vadd.f32 %v1750_v11, %v818_v12  ;;  %v1340_v12 = vld [vmem:[%s2529_s14 + $0x18] sm:$0xff] }
 0x788   :  { %1123 = vrot.lane.b32.xlu1 %v819_v13, %s2077_s6  ;;  %1935 = vmatprep.mubr.msk.f32.mxu1 %vm185_vm1, %v819_v13  ;;  %v1339_v13 = vld [vmem:[%s2529_s14 + $0x10] sm:$0xff] }
 0x789   :  { %1936 = vmatmul.mubr.msk.f32.vlgmr.msra.gmra.mxu1 %vm185_vm1, %v824_v14 }
 0x78a   :  { %1946 = vmatpush3.xpose.msk.msra.mxu1 %vm185_vm1, %v1130_v9 }
 0x78b   :  { %1947 = vmatprep.subr.msk.mxu1 %vm185_vm1, %v1128_v15 }
 0x78c   :  { %1125 = vrot.lane.b32.xlu1 %v824_v14, %s2077_s6  ;;  %v1338_v14 = vld [vmem:[%s2529_s14 + $0x8] sm:$0xff] }
 0x78e   :  { %1948 = vmatpush3.xpose.msk.msra.mxu1 %vm185_vm1, %v1128_v15  ;;  %v1337_v15 = vld [vmem:[%s2529_s14] sm:$0xff] }
 0x7fa   :  { %v1124_v16 = vpop.permute.xlu1 %1123 }
 0x7fb   :  { %1949 = vmatprep.mubr.msk.f32.mxu1 %vm185_vm1, %v1124_v16 }
 0x7fe   :  { %v1126_v17 = vpop.permute.xlu1 %1125 }
 0x7ff   :  { %1950 = vmatmul.mubr.msk.f32.vlgmr.msra.gmra.mxu1 %vm185_vm1, %v1126_v17 }
 0x849   :  { %v1937_v21 = vpop.f32.mrf.mxu1 }
 0x84a   :  { %v1011_v22 = vmul.f32 0.25, %v1937_v21 }
 0x84b   :  { %v1001_v24 = vpop.f32.mrf.mxu1 }
 0x84c   :  { %v1010_v25 = vmul.f32 0.25, %v1001_v24  ;;  %v1013_v26 = vadd.f32 %v1011_v22, %v922_v20  ;;  %v1768_v24 = vld [vmem:[%s2530_s15] ss:$0 sm:$0xff] }
 0x84e   :  { %v1017_v27 = vsel %vm185_vm1, %v1013_v26, -inf  ;;  %v1012_v28 = vadd.f32 %v1010_v25, %v921_v23 }
 0x84f   :  { %1018 = vmax.xlane.f32.xlu1 %v1017_v27 }
 0x850   :  { %v1014_v29 = vsel %vm185_vm1, %v1012_v28, -inf }
 0x851   :  { %1015 = vmax.xlane.f32.xlu0 %v1014_v29 }
 0x860   :  { %1038 = vrot.lane.b32.xlu1 %v2368_v6, %s2076_s28 }
 0x8bf   :  { %v1951_v30 = vpop.f32.mrf.mxu1 }
 0x8c0   :  { %v1215_v32 = vmul.f32 0.25, %v1951_v30 }
 0x8c1   :  { %v1205_v31 = vpop.f32.mrf.mxu1 }
 0x8c2   :  { %v1214_v33 = vmul.f32 0.25, %v1205_v31  ;;  %v1217_v36 = vadd.f32 %v1215_v32, %v922_v20 }
 0x8c4   :  { %v1216_v34 = vadd.f32 %v1214_v33, %v921_v23  ;;  %v1221_v37 = vsel %vm185_vm1, %v1217_v36, -inf }
 0x8c6   :  { %v1218_v35 = vsel %vm185_vm1, %v1216_v34, -inf }
 0x8c7   :  { %1219 = vmax.xlane.f32.xlu0 %v1218_v35 }
 0x8cb   :  { %1222 = vmax.xlane.f32.xlu0 %v1221_v37 }
 0x8d8   :  { %v1019_v38 = vpop.xlane.xlu1 %1018 }
 0x8d9   :  { %v1021_v39 = vsub.f32 %v1013_v26, %v1019_v38 }
 0x8da   :  { %v1016_v40 = vpop.xlane.xlu0 %1015 }
 0x8db   :  { %v1024_v5 = vmul.f32 1.442695, %v1021_v39  ;;  %v1020_v2 = vsub.f32 %v1012_v28, %v1016_v40 }
 0x8dc   :  { %v1039_v41 = vpop.permute.xlu1 %1038 }
 0x8dd   :  { %2029 = vpow2.f32 %v1024_v5  ;;  %v1022_v42 = vmul.f32 1.442695, %v1020_v2  ;;  %1938 = vmatprep.subr.mxu0 %v1039_v41  ;;  %v1477_v2 = vld [vmem:[%s2533_s18 + $0x10] sm:$0xff] }
 0x8de   :  { %1939 = vmatpush3.msra.mxu0 %v1039_v41  ;;  %v1476_v41 = vld [vmem:[%s2533_s18 + $0x8] sm:$0xff] }
 0x8df   :  { %2031 = vpow2.f32 %v1022_v42  ;;  %v1475_v42 = vld [vmem:[%s2533_s18] sm:$0xff] }
 0x8ea   :  { %v2030_v43 = vpop.eup %2029 }
 0x8eb   :  { %v1029_v44 = vsel %vm185_vm1, %v2030_v43, 0.0 }
 0x8ec   :  { %v2032_v45 = vpop.eup %2031  ;;  %1030 = vadd.xlane.f32.xlu0 %v1029_v44  ;;  %v1575_v44 = vld [vmem:[%s2535_s20 + $0x30] sm:$0xff] }
 0x8ed   :  { %v1026_v46 = vsel %vm185_vm1, %v2032_v45, 0.0 }
 0x8ee   :  { %1027 = vadd.xlane.f32.xlu1 %v1026_v46  ;;  %v1573_v46 = vld [vmem:[%s2535_s20 + $0x20] sm:$0xff] }
 0x8ff   :  { %1242 = vrot.lane.b32.xlu1 %v2368_v6, %s2075_s27 }
 0x950   :  { %v1220_v47 = vpop.xlane.xlu0 %1219 }
 0x951   :  { %v1224_v48 = vsub.f32 %v1216_v34, %v1220_v47 }
 0x953   :  { %v1226_v49 = vmul.f32 1.442695, %v1224_v48 }
 0x954   :  { %v1223_v50 = vpop.xlane.xlu0 %1222 }
 0x955   :  { %2033 = vpow2.f32 %v1226_v49  ;;  %v1225_v51 = vsub.f32 %v1217_v36, %v1223_v50 }
 0x957   :  { %v1228_v52 = vmul.f32 1.442695, %v1225_v51 }
 0x959   :  { %2035 = vpow2.f32 %v1228_v52 }
 0x962   :  { %v2034_v53 = vpop.eup %2033 }
 0x963   :  { %v1230_v54 = vsel %vm185_vm1, %v2034_v53, 0.0 }
 0x964   :  { %1231 = vadd.xlane.f32.xlu1 %v1230_v54  ;;  %v1771_v54 = vld [vmem:[%s2531_s16] ss:$0 sm:$0xff] }
 0x966   :  { %v2036_v55 = vpop.eup %2035 }
 0x967   :  { %v1233_v56 = vsel %vm185_vm1, %v2036_v55, 0.0 }
 0x968   :  { %1234 = vadd.xlane.f32.xlu0 %v1233_v56  ;;  %v1772_v56 = vld [vmem:[%s2532_s17] ss:$0 sm:$0xff] }
 0x975   :  { %1240 = vrot.lane.b32.xlu1 %v2374_v8, %s2075_s27  ;;  %v1031_v60 = vpop.xlane.xlu0 %1030 }
 0x977   :  { %v1028_v57 = vpop.xlane.xlu1 %1027 }
 0x978   :  { %2037 = vrcp.f32 %v1028_v57 }
 0x979   :  { %2039 = vrcp.f32 %v1031_v60 }
 0x97b   :  { %v1243_v61 = vpop.permute.xlu1 %1242 }
 0x97e   :  { %1036 = vrot.lane.b32.xlu0 %v2374_v8, %s2076_s28 }
 0x985   :  { %v2038_v58 = vpop.eup %2037 }
 0x986   :  { %v1034_v59 = vmul.f32 %v2038_v58, %v2032_v45  ;;  %v2040_v3 = vpop.eup %2039  ;;  %v1574_v45 = vld [vmem:[%s2535_s20 + $0x28] sm:$0xff] }
 0x987   :  { %v1035_v6 = vmul.f32 %v2040_v3, %v2030_v43  ;;  %v1576_v43 = vld [vmem:[%s2535_s20 + $0x38] sm:$0xff]  ;;  %v1571_v3 = vld [vmem:[%s2535_s20 + $0x10] sm:$0xff] }
 0x988   :  { %1942 = vmatprep.mubr.msk.f32.mxu0 %vm185_vm1, %v1034_v59 }
 0x9ed   :  { %v1232_v62 = vpop.xlane.xlu1 %1231 }
 0x9ee   :  { %2041 = vrcp.f32 %v1232_v62 }
 0x9f1   :  { %v1235_v0 = vpop.xlane.xlu0 %1234  ;;  %v1241_v7 = vpop.permute.xlu1 %1240 }
 0x9f2   :  { %2043 = vrcp.f32 %v1235_v0  ;;  %v1572_v0 = vld [vmem:[%s2535_s20 + $0x18] sm:$0xff] }
 0x9f5   :  { %v1037_v4 = vpop.permute.xlu0 %1036 }
 0x9f6   :  { %1940 = vmatprep.subr.mxu0 %v1037_v4 }
 0x9f7   :  { %1941 = vmatpush3.msra.mxu0 %v1037_v4  ;;  %v1570_v4 = vld [vmem:[%s2535_s20 + $0x8] sm:$0xff] }
 0x9f8   :  { %1943 = vmatmul.mubr.msk.f32.vlgmr.msra.gmra.mxu0 %vm185_vm1, %v1035_v6  ;;  %1952 = vmatprep.subr.mxu0 %v1243_v61  ;;  %v1569_v6 = vld [vmem:[%s2535_s20] sm:$0xff] }
 0x9f9   :  { %1953 = vmatpush3.msra.mxu0 %v1243_v61 }
 0x9fa   :  { %1954 = vmatprep.subr.mxu0 %v1241_v7 }
 0x9fb   :  { %v2042_v8 = vpop.eup %2041  ;;  %1955 = vmatpush3.msra.mxu0 %v1241_v7  ;;  %v1773_v7 = vld [vmem:[%s2534_s19] ss:$0 sm:$0xff] }
 0x9fc   :  { %v1238_v9 = vmul.f32 %v2042_v8, %v2034_v53  ;;  %1959 = vmatprep.subr.mxu0 %v1340_v12 }
 0x9fe   :  { %1956 = vmatprep.mubr.msk.f32.mxu0 %vm185_vm1, %v1238_v9 }
 0x9ff   :  { %v2044_v10 = vpop.eup %2043 }
 0xa00   :  { %v1239_v11 = vmul.f32 %v2044_v10, %v2036_v55 }
 0xa02   :  { %1957 = vmatmul.mubr.msk.f32.vlgmr.msra.gmra.mxu0 %vm185_vm1, %v1239_v11 }
 0xa03   :  { %1960 = vmatpush3.msra.mxu0 %v1340_v12 }
 0xa04   :  { %1961 = vmatprep.subr.mxu0 %v1339_v13 }
 0xa05   :  { %1962 = vmatpush3.msra.mxu0 %v1339_v13 }
 0xa06   :  { %1963 = vmatprep.subr.mxu0 %v1338_v14 }
 0xa07   :  { %1964 = vmatpush3.msra.mxu0 %v1338_v14  ;;  %v1776_v14 = vld [vmem:[%s2536_s21] ss:$0 sm:$0xff] }
 0xa08   :  { %1965 = vmatprep.subr.mxu0 %v1337_v15 }
 0xa09   :  { %1966 = vmatpush3.msra.mxu0 %v1337_v15 }
 0xa0a   :  { %1981 = vmatprep.subr.mxu0 %v1576_v43 }
 0xab8   :  { %v1944_v16 = vpop.f32.mrf.mxu0 }
 0xaba   :  { %v1114_v17 = vpop.f32.mrf.mxu0 }
 0xac2   :  { %v1958_v18 = vpop.f32.mrf.mxu0 }
 0xac3   :  { %1331 = vrot.lane.b32.xlu1 %v1958_v18, %s2080_s30 }
 0xac4   :  { %v1318_v19 = vpop.f32.mrf.mxu0 }
 0xac5   :  { %1329 = vrot.lane.b32.xlu0 %v1318_v19, %s2080_s30 }
 0xb35   :  { %v1332_v20 = vpop.permute.xlu1 %1331 }
 0xb36   :  { %v1336_v23 = vsel %vm185_vm1, %v1944_v16, %v1332_v20 }
 0xb37   :  { %v1330_v21 = vpop.permute.xlu0 %1329 }
 0xb38   :  { %v1335_v22 = vsel %vm185_vm1, %v1114_v17, %v1330_v21 }
 0xb39   :  { %1967 = vmatprep.mubr.msk.f32.mxu0 %vm93_vm0, %v1335_v22 }
 0xb3a   :  { %1968 = vmatmul.mubr.msk.f32.vlgmr.msra.gmra.mxu0 %vm93_vm0, %v1336_v23 }
 0xb3b   :  { %1982 = vmatpush3.msra.mxu0 %v1576_v43 }
 0xb3c   :  { %1983 = vmatprep.subr.mxu0 %v1575_v44 }
 0xb3d   :  { %1984 = vmatpush3.msra.mxu0 %v1575_v44 }
 0xb3e   :  { %1985 = vmatprep.subr.mxu0 %v1574_v45 }
 0xb3f   :  { %1986 = vmatpush3.msra.mxu0 %v1574_v45 }
 0xb40   :  { %1987 = vmatprep.subr.mxu0 %v1573_v46 }
 0xb41   :  { %1988 = vmatpush3.msra.mxu0 %v1573_v46 }
 0xb42   :  { %1989 = vmatprep.subr.mxu0 %v1572_v0 }
 0xb43   :  { %1990 = vmatpush3.msra.mxu0 %v1572_v0 }
 0xb44   :  { %1991 = vmatprep.subr.mxu0 %v1571_v3 }
 0xb45   :  { %1992 = vmatpush3.msra.mxu0 %v1571_v3 }
 0xb46   :  { %1993 = vmatprep.subr.mxu0 %v1570_v4 }
 0xb47   :  { %1994 = vmatpush3.msra.mxu0 %v1570_v4 }
 0xb48   :  { %1995 = vmatprep.subr.mxu0 %v1569_v6 }
 0xb49   :  { %1996 = vmatpush3.msra.mxu0 %v1569_v6 }
 0xbfa   :  { %v1969_v25 = vpop.f32.mrf.mxu0 }
 0xbfb   :  { %v1426_v26 = vadd.f32 %v1969_v25, %v1768_v24 }
 0xbfc   :  { %v1420_v27 = vpop.f32.mrf.mxu0 }
 0xbfd   :  { %v1421_v28 = vadd.f32 %v1768_v24, %v1420_v27  ;;  %v1432_v29 = vadd.f32 %v1426_v26, %v2361_v1 }
 0xbff   :  { %v1436_v30 = vsel %vm93_vm0, %v1432_v29, 0.0  ;;  %v1431_v31 = vadd.f32 %v1421_v28, %v2357_v63  ;;  %v1478_v63 = vld [vmem:[%s2533_s18 + $0x18] sm:$0xff] }
 0xc00   :  { %1437 = vadd.xlane.f32.xlu1 %v1436_v30  ;;  %1970 = vmatprep.subr.mxu1 %v1478_v63 }
 0xc01   :  { %v1433_v32 = vsel %vm93_vm0, %v1431_v31, 0.0  ;;  %1971 = vmatpush3.msra.mxu1 %v1478_v63  ;;  %v1780_v63 = vld [vmem:[%s2538_s23] ss:$0 sm:$0xff] }
 0xc02   :  { %1434 = vadd.xlane.f32.xlu0 %v1433_v32  ;;  %1972 = vmatprep.subr.mxu1 %v1477_v2 }
 0xc03   :  { %1973 = vmatpush3.msra.mxu1 %v1477_v2 }
 0xc04   :  { %1974 = vmatprep.subr.mxu1 %v1476_v41 }
 0xc05   :  { %1975 = vmatpush3.msra.mxu1 %v1476_v41 }
 0xc06   :  { %1976 = vmatprep.subr.mxu1 %v1475_v42 }
 0xc07   :  { %1977 = vmatpush3.msra.mxu1 %v1475_v42 }
 0xc89   :  { %v1438_v33 = vpop.xlane.xlu1 %1437 }
 0xc8a   :  { %v1440_v34 = vmul.f32 0.03125, %v1438_v33 }
 0xc8b   :  { %v1435_v35 = vpop.xlane.xlu0 %1434 }
 0xc8c   :  { %v1439_v36 = vmul.f32 0.03125, %v1435_v35  ;;  %v1442_v37 = vsub.f32 %v1432_v29, %v1440_v34 }
 0xc8e   :  { %v1441_v38 = vsub.f32 %v1431_v31, %v1439_v36  ;;  %v1444_v5 = vmul.f32 %v1442_v37, %v1442_v37 }
 0xc90   :  { %v1443_v39 = vmul.f32 %v1441_v38, %v1441_v38  ;;  %v1448_v1 = vsel %vm93_vm0, %v1444_v5, 0.0 }
 0xc92   :  { %v1445_v40 = vsel %vm93_vm0, %v1443_v39, 0.0 }
 0xc93   :  { %1446 = vadd.xlane.f32.xlu0 %v1445_v40  ;;  %v1779_v40 = vld [vmem:[%s2537_s22] ss:$0 sm:$0xff] }
 0xc97   :  { %1449 = vadd.xlane.f32.xlu0 %v1448_v1 }
 0xd1c   :  { %v1447_v47 = vpop.xlane.xlu0 %1446 }
 0xd1d   :  { %v1451_v48 = vmul.f32 0.03125, %v1447_v47 }
 0xd1f   :  { %v1453_v49 = vadd.f32 1e-05, %v1451_v48 }
 0xd20   :  { %v1450_v50 = vpop.xlane.xlu0 %1449 }
 0xd21   :  { %2045 = vrsqrt.f32 %v1453_v49  ;;  %v1452_v51 = vmul.f32 0.03125, %v1450_v50 }
 0xd23   :  { %v1454_v52 = vadd.f32 1e-05, %v1452_v51 }
 0xd25   :  { %2047 = vrsqrt.f32 %v1454_v52 }
 0xd2e   :  { %v2046_v53 = vpop.eup %2045 }
 0xd2f   :  { %v1457_v55 = vmul.f32 %v2046_v53, %v1441_v38 }
 0xd31   :  { %v1465_v57 = vmul.f32 %v1771_v54, %v1457_v55 }
 0xd32   :  { %v2048_v58 = vpop.eup %2047 }
 0xd33   :  { %v1458_v59 = vmul.f32 %v2048_v58, %v1442_v37  ;;  %v1473_v60 = vadd.f32 %v1772_v56, %v1465_v57 }
 0xd35   :  { %v1466_v61 = vmul.f32 %v1771_v54, %v1458_v59  ;;  %1978 = vmatprep.mubr.msk.f32.mxu1 %vm93_vm0, %v1473_v60 }
 0xd37   :  { %v1474_v62 = vadd.f32 %v1772_v56, %v1466_v61 }
 0xd39   :  { %1979 = vmatmul.mubr.msk.f32.vlgmr.msra.gmra.mxu1 %vm93_vm0, %v1474_v62 }
 0xdf9   :  { %v1980_v8 = vpop.f32.mrf.mxu1 }
 0xdfa   :  { %v1564_v9 = vadd.f32 %v1980_v8, %v1773_v7 }
 0xdfb   :  { %v1558_v10 = vpop.f32.mrf.mxu1 }
 0xdfc   :  { %v1559_v11 = vadd.f32 %v1773_v7, %v1558_v10  ;;  %v1568_v13 = vmax.f32 %v1564_v9, 0.0 }
 0xdfe   :  { %v1567_v12 = vmax.f32 %v1559_v11, 0.0 }
 0xe00   :  { %1997 = vmatprep.mubr.msk.f32.mxu0 %vm1584_vm2, %v1567_v12 }
 0xe01   :  { %1998 = vmatmul.mubr.msk.f32.vlgmr.msra.gmra.mxu0 %vm1584_vm2, %v1568_v13 }
 0xec1   :  { %v1999_v15 = vpop.f32.mrf.mxu0 }
 0xec2   :  { %v1663_v16 = vadd.f32 %v1999_v15, %v1776_v14 }
 0xec3   :  { %v1657_v17 = vpop.f32.mrf.mxu0 }
 0xec4   :  { %v1658_v18 = vadd.f32 %v1776_v14, %v1657_v17  ;;  %v1669_v19 = vadd.f32 %v1663_v16, %v1474_v62 }
 0xec6   :  { %v1673_v20 = vsel %vm93_vm0, %v1669_v19, 0.0  ;;  %v1668_v21 = vadd.f32 %v1658_v18, %v1473_v60 }
 0xec7   :  { %1674 = vadd.xlane.f32.xlu0 %v1673_v20 }
 0xec8   :  { %v1670_v22 = vsel %vm93_vm0, %v1668_v21, 0.0 }
 0xec9   :  { %1671 = vadd.xlane.f32.xlu1 %v1670_v22 }
 0xf50   :  { %v1675_v23 = vpop.xlane.xlu0 %1674 }
 0xf51   :  { %v1677_v24 = vmul.f32 0.03125, %v1675_v23 }
 0xf52   :  { %v1672_v25 = vpop.xlane.xlu1 %1671 }
 0xf53   :  { %v1679_v26 = vsub.f32 %v1669_v19, %v1677_v24  ;;  %v1676_v27 = vmul.f32 0.03125, %v1672_v25 }
 0xf55   :  { %v1678_v28 = vsub.f32 %v1668_v21, %v1676_v27  ;;  %v1681_v29 = vmul.f32 %v1679_v26, %v1679_v26 }
 0xf57   :  { %v1685_v30 = vsel %vm93_vm0, %v1681_v29, 0.0  ;;  %v1680_v31 = vmul.f32 %v1678_v28, %v1678_v28 }
 0xf58   :  { %1686 = vadd.xlane.f32.xlu0 %v1685_v30 }
 0xf59   :  { %v1682_v32 = vsel %vm93_vm0, %v1680_v31, 0.0 }
 0xf5a   :  { %1683 = vadd.xlane.f32.xlu1 %v1682_v32 }
 0xfe1   :  { %v1687_v33 = vpop.xlane.xlu0 %1686 }
 0xfe2   :  { %v1689_v34 = vmul.f32 0.03125, %v1687_v33 }
 0xfe3   :  { %v1684_v35 = vpop.xlane.xlu1 %1683 }
 0xfe4   :  { %v1691_v36 = vadd.f32 1e-05, %v1689_v34  ;;  %v1688_v37 = vmul.f32 0.03125, %v1684_v35 }
 0xfe6   :  { %2049 = vrsqrt.f32 %v1691_v36  ;;  %v1690_v38 = vadd.f32 1e-05, %v1688_v37 }
 0xfe8   :  { %2051 = vrsqrt.f32 %v1690_v38 }
 0xff3   :  { %v2050_v39 = vpop.eup %2049 }
 0xff4   :  { %v1695_v5 = vmul.f32 %v2050_v39, %v1679_v26 }
 0xff5   :  { %v2052_v1 = vpop.eup %2051 }
 0xff6   :  { %v1694_v2 = vmul.f32 %v2052_v1, %v1678_v28  ;;  %v1703_v41 = vmul.f32 %v1779_v40, %v1695_v5 }
 0xff8   :  { %v1702_v42 = vmul.f32 %v1779_v40, %v1694_v2  ;;  %v1711_v43 = vadd.f32 %v1780_v63, %v1703_v41 }
 0xffa   :  { %v1710_v44 = vadd.f32 %v1780_v63, %v1702_v42  ;;  %1713 = vst.msk [vmem:[#allocation2 + $0x8] sm:$0xff] %vm93_vm0, %v1711_v43 }
 0xffc   :  { %1712 = vst.msk [vmem:[#allocation2] sm:$0xff] %vm93_vm0, %v1710_v44 }
 0xffd   :  { %2064 = shalt.err (!%p2061_p4)
}
 0xffe   :  { %s2082_s22 = smov 128   ;;  %s2083_s23 = smov 8  }
 0xfff   :  { %1725 = dma.vmem_to_hbm [thread:$0]  %s1720_s29, 256, %s2539_s24, [#allocation3], %s2082_s22, %s2082_s22, %s2083_s23  }
0x1000   :  { %2073 = dma.done.wait [#allocation3], 256  }
0x1001   :  { %2074 = vsyncadd [#allocation3], 4294967040 }
0x1002   :  { %1729 = vsyncpa [#allocation3], 1 }

</bundles_post_ra>
